<compile_context>
chip_gen: v7x
topology: tpu7x:2x2x1
jax: 0.10.0
libtpu: 0.0.40
codegen_flags: <defaults>
</compile_context>

<pallas_src>
import math

import jax
import jax.numpy as jnp
from jax import lax
from jax.experimental import pallas as pl
from jax.experimental.pallas import tpu as pltpu
from jax.scipy.linalg import block_diag

H = 64            # GRU hidden size (eye/head/gw all use 64)
G = 3 * H         # 192: lane width of the fused hidden slab [h_eye|h_head|h_gw]
FC1 = 64
FC2 = 64
BN_EPS = 1e-5


# ----------------------------- Pallas kernel --------------------------------
def ehtask_kernel(gx_ref, whh_ref, bhn_ref, w1f_ref, fc1p_ref,
                  s1_ref, t1_ref, w2_ref, b2_ref, s2_ref, t2_ref,
                  w3_ref, b3_ref, out_ref):
    B = out_ref.shape[0]
    L = gx_ref.shape[0]

    # Loop-invariant broadcast hoisted once (JAX does not CSE broadcast_in_dim).
    bhn = jnp.broadcast_to(bhn_ref[...], (B, G))

    def step(t, h):
        # ONE block-diagonal recurrent matmul on the serial chain:
        # (B,192) x (192,576) -> (B,576).  Column order matches gx:
        # [r_e r_h r_g | z_e z_h z_g | n_e n_h n_g].
        gh = jnp.dot(h.astype(jnp.bfloat16), whh_ref[...],
                     preferred_element_type=jnp.float32)
        gx = gx_ref[t]                                        # one lane-dense load
        rz = jax.nn.sigmoid(gx[:, :2 * G] + gh[:, :2 * G])    # fused r/z sigmoid
        r = rz[:, :G]
        z = rz[:, G:]
        n = jnp.tanh(gx[:, 2 * G:] + r * (gh[:, 2 * G:] + bhn))   # fused tanh
        return (1.0 - z) * n + z * h

    h0 = jnp.zeros((B, G), jnp.float32)
    hT = lax.fori_loop(0, L, step, h0, unroll=True)   # L static -> fully unrolled

    # FC1: forward halves of the BiGRU concat as one (B,192)x(192,64) dot; the
    # backward halves + fc1 bias were folded into fc1p in the wrapper.
    acc = jnp.dot(hT.astype(jnp.bfloat16), w1f_ref[...],
                  preferred_element_type=jnp.float32) + fc1p_ref[...]
    h1 = jnp.maximum(acc * s1_ref[...] + t1_ref[...], 0.0)
    # TODO(synk): Dropout(p=0.5) has no deterministic forward; eval-mode identity used.
    h2 = jnp.dot(h1.astype(jnp.bfloat16), w2_ref[...],
                 preferred_element_type=jnp.float32) + b2_ref[...]
    h2 = jnp.maximum(h2 * s2_ref[...] + t2_ref[...], 0.0)
    out_ref[...] = jnp.dot(h2.astype(jnp.bfloat16), w3_ref[...],
                           preferred_element_type=jnp.float32) + b3_ref[...]


# ------------------------------ parameters ----------------------------------
def _uniform(key, shape, k):
    return jax.random.uniform(key, shape, jnp.float32, -k, k)


def init_params(key, num_classes):
    keys = jax.random.split(key, 40)
    ki = iter(keys)
    p = {}
    kg = 1.0 / math.sqrt(H)
    for name in ("eye", "head", "gw"):
        for d in ("f", "b"):                        # forward / backward dirs
            p[f"{name}_wih_{d}"] = _uniform(next(ki), (3 * H, 2), kg)
            p[f"{name}_whh_{d}"] = _uniform(next(ki), (3 * H, H), kg)
            p[f"{name}_bih_{d}"] = _uniform(next(ki), (3 * H,), kg)
            p[f"{name}_bhh_{d}"] = _uniform(next(ki), (3 * H,), kg)
    in1 = 3 * 2 * H                                  # 384
    k1 = 1.0 / math.sqrt(in1)
    p["fc1_w"] = _uniform(next(ki), (FC1, in1), k1)
    p["fc1_b"] = _uniform(next(ki), (FC1,), k1)
    k2 = 1.0 / math.sqrt(FC1)
    p["fc2_w"] = _uniform(next(ki), (FC2, FC1), k2)
    p["fc2_b"] = _uniform(next(ki), (FC2,), k2)
    k3 = 1.0 / math.sqrt(FC2)
    p["fc3_w"] = _uniform(next(ki), (num_classes, FC2), k3)
    p["fc3_b"] = _uniform(next(ki), (num_classes,), k3)
    # BatchNorm1d (inference): nontrivial deterministic gamma/beta/mean/var.
    for i in (1, 2):
        p[f"bn{i}_g"] = 1.0 + 0.1 * _uniform(next(ki), (64,), 1.0)
        p[f"bn{i}_b"] = 0.1 * _uniform(next(ki), (64,), 1.0)
        p[f"bn{i}_m"] = 0.1 * _uniform(next(ki), (64,), 1.0)
        p[f"bn{i}_v"] = 1.0 + 0.1 * _uniform(next(ki), (64,), 1.0)
    return p


# ------------------------------- wrapper -------------------------------------
def ehtask_forward(params, x, eye_sz, head_sz, gw_sz, num_classes):
    B = x.shape[0]
    PH = lax.Precision.HIGHEST     # exact f32 for the one-off wrapper projections

    names = ("eye", "head", "gw")
    sizes = (eye_sz, head_sz, gw_sz)
    seqs, off = [], 0
    for sz in sizes:
        seqs.append(x[:, off:off + sz].reshape(B, sz // 2, 2))
        off += sz
    lens = [s.shape[1] for s in seqs]
    Lmax = max(lens)

    gr_b, gz_b, gn_b = [], [], []       # per-modality forward gate preactivations
    whh_r, whh_z, whh_n = [], [], []    # per-modality forward recurrent gate blocks
    bhn_list, hb_list = [], []
    for name, seq, L in zip(names, seqs, lens):
        wih_f, whh_f = params[f"{name}_wih_f"], params[f"{name}_whh_f"]
        bih_f, bhh_f = params[f"{name}_bih_f"], params[f"{name}_bhh_f"]
        wih_b = params[f"{name}_wih_b"]
        bih_b, bhh_b = params[f"{name}_bih_b"], params[f"{name}_bhh_b"]

        # Forward dir: x @ W_ih + b_ih (+ h-independent b_hh for r/z), all steps.
        seq_t = jnp.swapaxes(seq, 0, 1)                          # (L, B, 2)
        gxf = jnp.dot(seq_t, wih_f.T, precision=PH) + bih_f      # (L, B, 3H)
        gr = gxf[..., 0:H] + bhh_f[0:H]
        gz = gxf[..., H:2 * H] + bhh_f[H:2 * H]
        gn = gxf[..., 2 * H:3 * H]        # b_hh_n stays inside r * (.)
        pad = Lmax - L
        if pad:
            # Freeze h for t >= L (gz = 1e4 => z == 1 exactly in f32 => h_{t+1}
            # = h_t) so modalities of different length share one fused loop.
            gr = jnp.pad(gr, ((0, pad), (0, 0), (0, 0)))
            gz = jnp.pad(gz, ((0, pad), (0, 0), (0, 0)), constant_values=1e4)
            gn = jnp.pad(gn, ((0, pad), (0, 0), (0, 0)))
        gr_b.append(gr); gz_b.append(gz); gn_b.append(gn)

        whh_r.append(whh_f[0:H, :].T)
        whh_z.append(whh_f[H:2 * H, :].T)
        whh_n.append(whh_f[2 * H:3 * H, :].T)
        bhn_list.append(bhh_f[2 * H:3 * H])

        # Backward dir: out[:, -1, :] backward half is the FIRST backward step
        # from h0 == 0 -> purely elementwise on x[L-1]; fully done here (f32).
        gxb = jnp.dot(seq[:, -1, :], wih_b.T, precision=PH) + bih_b   # (B, 3H)
        rb = jax.nn.sigmoid(gxb[:, 0:H] + bhh_b[0:H])
        zb = jax.nn.sigmoid(gxb[:, H:2 * H] + bhh_b[H:2 * H])
        nb = jnp.tanh(gxb[:, 2 * H:3 * H] + rb * bhh_b[2 * H:3 * H])
        hb_list.append((1.0 - zb) * nb)

    # Lane-dense gx slab, columns [r_e r_h r_g | z_e z_h z_g | n_e n_h n_g].
    gx = jnp.concatenate(gr_b + gz_b + gn_b, axis=-1)            # (Lmax, B, 9H)
    # Block-diagonal forward W_hh in the matching column order.
    wbd = jnp.concatenate([block_diag(*whh_r), block_diag(*whh_z),
                           block_diag(*whh_n)], axis=1)          # (3H, 9H)
    bhn = jnp.concatenate(bhn_list)[None, :]                     # (1, 3H)

    # FC1 split: forward rows (matching the [he|hh|hg] slab) stay in the
    # kernel; backward rows + fc1 bias are folded into a (B, 64) partial here.
    # PyTorch concat order of the 384 features: [eye_f, eye_b, head_f, head_b,
    # gw_f, gw_b].
    w1t = params["fc1_w"].T                                      # (384, 64)
    w1f = jnp.concatenate([w1t[0:H], w1t[2 * H:3 * H], w1t[4 * H:5 * H]], axis=0)
    fc1p = (jnp.dot(hb_list[0], w1t[H:2 * H], precision=PH)
            + jnp.dot(hb_list[1], w1t[3 * H:4 * H], precision=PH)
            + jnp.dot(hb_list[2], w1t[5 * H:6 * H], precision=PH)
            + params["fc1_b"][None, :])

    def bn_fold(g, b, m, v):
        s = g / jnp.sqrt(v + BN_EPS)
        return s[None, :], (b - m * s)[None, :]

    s1, t1 = bn_fold(params["bn1_g"], params["bn1_b"], params["bn1_m"], params["bn1_v"])
    s2, t2 = bn_fold(params["bn2_g"], params["bn2_b"], params["bn2_m"], params["bn2_v"])

    bf16 = jnp.bfloat16
    inputs = [
        gx,                          # (Lmax, B, 9H) f32 precomputed gate inputs
        wbd.astype(bf16),            # (3H, 9H)  block-diagonal W_hh (fwd)
        bhn,                         # (1, 3H)   b_hh_n (fwd)
        w1f.astype(bf16),            # (3H, 64)  FC1 forward-row block
        fc1p,                        # (B, 64)   FC1 backward partial + bias
        s1, t1,
        params["fc2_w"].T.astype(bf16), params["fc2_b"][None, :], s2, t2,
        params["fc3_w"].T.astype(bf16), params["fc3_b"][None, :],
    ]
    # TODO(synk): production batch sizes -> leading "parallel" batch grid axis
    # (uses both v7x TensorCores), per-generation VMEM tile sizing.
    return pl.pallas_call(
        ehtask_kernel,
        out_shape=jax.ShapeDtypeStruct((B, num_classes), jnp.float32),
        in_specs=[pl.BlockSpec(memory_space=pltpu.MemorySpace.VMEM)] * len(inputs),
        out_specs=pl.BlockSpec(memory_space=pltpu.MemorySpace.VMEM),
    )(*inputs)


# --------------------------- pure-JAX reference -------------------------------
def reference_forward(params, x, eye_sz, head_sz, gw_sz):
    PH = lax.Precision.HIGHEST     # exact-f32 baseline
    B = x.shape[0]

    def bigru_last(seq, name):                       # seq: (B, L, 2)
        def make_cell(d):
            wih, whh = params[f"{name}_wih_{d}"], params[f"{name}_whh_{d}"]
            bih, bhh = params[f"{name}_bih_{d}"], params[f"{name}_bhh_{d}"]

            def cell(h, x_t):
                gx = jnp.dot(x_t, wih.T, precision=PH) + bih
                gh = jnp.dot(h, whh.T, precision=PH) + bhh
                r = jax.nn.sigmoid(gx[:, :H] + gh[:, :H])
                z = jax.nn.sigmoid(gx[:, H:2 * H] + gh[:, H:2 * H])
                n = jnp.tanh(gx[:, 2 * H:] + r * gh[:, 2 * H:])
                hn = (1.0 - z) * n + z * h
                return hn, hn
            return cell

        h0 = jnp.zeros((B, H), jnp.float32)
        hT, _ = lax.scan(make_cell("f"), h0, jnp.swapaxes(seq, 0, 1))
        hB, _ = make_cell("b")(h0, seq[:, -1, :])
        return jnp.concatenate([hT, hB], axis=1)

    eye = x[:, :eye_sz].reshape(B, -1, 2)
    head = x[:, eye_sz:eye_sz + head_sz].reshape(B, -1, 2)
    gw = x[:, eye_sz + head_sz:].reshape(B, -1, 2)
    feat = jnp.concatenate([bigru_last(eye, "eye"),
                            bigru_last(head, "head"),
                            bigru_last(gw, "gw")], axis=1)

    def bn(v, g, b, m, var):
        return g * (v - m) / jnp.sqrt(var + BN_EPS) + b

    h1 = jax.nn.relu(bn(jnp.dot(feat, params["fc1_w"].T, precision=PH) + params["fc1_b"],
                        params["bn1_g"], params["bn1_b"], params["bn1_m"], params["bn1_v"]))
    h2 = jax.nn.relu(bn(jnp.dot(h1, params["fc2_w"].T, precision=PH) + params["fc2_b"],
                        params["bn2_g"], params["bn2_b"], params["bn2_m"], params["bn2_v"]))
    return jnp.dot(h2, params["fc3_w"].T, precision=PH) + params["fc3_b"]


if __name__ == "__main__":
    eye_sz, head_sz, gw_sz, num_classes = 16, 16, 16, 4   # -> seq lens 8/8/8
    B = 2
    key = jax.random.PRNGKey(0)
    kp, kx = jax.random.split(key)
    params = init_params(kp, num_classes)
    x = jax.random.normal(kx, (B, eye_sz + head_sz + gw_sz), jnp.float32)

    out = jax.block_until_ready(
        ehtask_forward(params, x, eye_sz, head_sz, gw_sz, num_classes))
    ref = reference_forward(params, x, eye_sz, head_sz, gw_sz)

    assert out.shape == (B, num_classes)
    # The kernel's recurrent / FC matmuls deliberately run as bf16 MXU dots
    # with f32 accumulation (per perf guidance); the reference is exact-f32
    # ('highest').  The resulting drift grows with sequence length L; at the
    # L = 8 of this test a 1e-2 tolerance absorbs it with ample margin while
    # still catching any structural/layout bug (which would be O(0.1+)).
    assert jnp.allclose(out, ref, atol=1e-2, rtol=1e-2), (out, ref)
    print("KERNEL_OK")
</pallas_src>

<mosaic_0001>
module attributes {stable_mosaic.version = 11 : i64} {
  func.func @ehtask_kernel(%arg0: memref<8x2x576xf32, #tpu.memory_space<vmem>>, %arg1: memref<192x576xbf16, #tpu.memory_space<vmem>>, %arg2: memref<1x192xf32, #tpu.memory_space<vmem>>, %arg3: memref<192x64xbf16, #tpu.memory_space<vmem>>, %arg4: memref<2x64xf32, #tpu.memory_space<vmem>>, %arg5: memref<1x64xf32, #tpu.memory_space<vmem>>, %arg6: memref<1x64xf32, #tpu.memory_space<vmem>>, %arg7: memref<64x64xbf16, #tpu.memory_space<vmem>>, %arg8: memref<1x64xf32, #tpu.memory_space<vmem>>, %arg9: memref<1x64xf32, #tpu.memory_space<vmem>>, %arg10: memref<1x64xf32, #tpu.memory_space<vmem>>, %arg11: memref<64x4xbf16, #tpu.memory_space<vmem>>, %arg12: memref<1x4xf32, #tpu.memory_space<vmem>>, %arg13: memref<2x4xf32, #tpu.memory_space<vmem>>) attributes {dimension_semantics = [], scalar_prefetch = 0 : i64, scratch_operands = 0 : i64, tpu.core_type = #tpu.core_type<tc>} {
    %c0 = arith.constant 0 : index
    %c0_0 = arith.constant 0 : index
    %0 = vector.load %arg2[%c0, %c0_0] : memref<1x192xf32, #tpu.memory_space<vmem>>, vector<1x192xf32>
    %1 = vector.shape_cast %0 : vector<1x192xf32> to vector<1x192xf32>
    %2 = vector.broadcast %1 : vector<1x192xf32> to vector<2x192xf32>
    %cst = arith.constant 0.000000e+00 : f32
    %3 = vector.broadcast %cst : f32 to vector<2x192xf32>
    %c0_i32 = arith.constant 0 : i32
    %4 = arith.truncf %3 : vector<2x192xf32> to vector<2x192xbf16>
    %c0_1 = arith.constant 0 : index
    %c0_2 = arith.constant 0 : index
    %5 = vector.load %arg1[%c0_1, %c0_2] : memref<192x576xbf16, #tpu.memory_space<vmem>>, vector<192x576xbf16>
    %cst_3 = arith.constant dense<0.000000e+00> : vector<2x576xf32>
    %6 = tpu.matmul %4, %5, %cst_3 {dimension_numbers = #tpu.dot_dimension_numbers<[1], [0], [0], [1], [0, 0, 1, 1], [], []>} : vector<2x192xbf16>, vector<192x576xbf16>, vector<2x576xf32> -> vector<2x576xf32>
    %7 = arith.index_cast %c0_i32 : i32 to index
    %c0_4 = arith.constant 0 : index
    %c0_5 = arith.constant 0 : index
    %8 = vector.load %arg0[%7, %c0_4, %c0_5] : memref<8x2x576xf32, #tpu.memory_space<vmem>>, vector<1x2x576xf32>
    %9 = vector.shape_cast %8 : vector<1x2x576xf32> to vector<2x576xf32>
    %10 = vector.extract_strided_slice %9 {offsets = [0, 0], sizes = [2, 384], strides = [1, 1]} : vector<2x576xf32> to vector<2x384xf32>
    %11 = vector.extract_strided_slice %6 {offsets = [0, 0], sizes = [2, 384], strides = [1, 1]} : vector<2x576xf32> to vector<2x384xf32>
    %12 = arith.addf %10, %11 : vector<2x384xf32>
    %13 = arith.negf %12 : vector<2x384xf32>
    %14 = math.exp %13 : vector<2x384xf32>
    %cst_6 = arith.constant 1.000000e+00 : f32
    %15 = vector.broadcast %cst_6 : f32 to vector<2x384xf32>
    %16 = arith.addf %15, %14 : vector<2x384xf32>
    %17 = arith.divf %15, %16 : vector<2x384xf32>
    %18 = vector.extract_strided_slice %17 {offsets = [0, 0], sizes = [2, 192], strides = [1, 1]} : vector<2x384xf32> to vector<2x192xf32>
    %19 = vector.extract_strided_slice %17 {offsets = [0, 192], sizes = [2, 192], strides = [1, 1]} : vector<2x384xf32> to vector<2x192xf32>
    %20 = vector.extract_strided_slice %9 {offsets = [0, 384], sizes = [2, 192], strides = [1, 1]} : vector<2x576xf32> to vector<2x192xf32>
    %21 = vector.extract_strided_slice %6 {offsets = [0, 384], sizes = [2, 192], strides = [1, 1]} : vector<2x576xf32> to vector<2x192xf32>
    %22 = arith.addf %21, %2 : vector<2x192xf32>
    %23 = arith.mulf %18, %22 : vector<2x192xf32>
    %24 = arith.addf %20, %23 : vector<2x192xf32>
    %25 = math.tanh %24 : vector<2x192xf32>
    %cst_7 = arith.constant 1.000000e+00 : f32
    %26 = vector.broadcast %cst_7 : f32 to vector<2x192xf32>
    %27 = arith.subf %26, %19 : vector<2x192xf32>
    %28 = arith.mulf %27, %25 : vector<2x192xf32>
    %29 = arith.mulf %19, %3 : vector<2x192xf32>
    %30 = arith.addf %28, %29 : vector<2x192xf32>
    %c1_i32 = arith.constant 1 : i32
    %31 = arith.truncf %30 : vector<2x192xf32> to vector<2x192xbf16>
    %c0_8 = arith.constant 0 : index
    %c0_9 = arith.constant 0 : index
    %32 = vector.load %arg1[%c0_8, %c0_9] : memref<192x576xbf16, #tpu.memory_space<vmem>>, vector<192x576xbf16>
    %cst_10 = arith.constant dense<0.000000e+00> : vector<2x576xf32>
    %33 = tpu.matmul %31, %32, %cst_10 {dimension_numbers = #tpu.dot_dimension_numbers<[1], [0], [0], [1], [0, 0, 1, 1], [], []>} : vector<2x192xbf16>, vector<192x576xbf16>, vector<2x576xf32> -> vector<2x576xf32>
    %34 = arith.index_cast %c1_i32 : i32 to index
    %c0_11 = arith.constant 0 : index
    %c0_12 = arith.constant 0 : index
    %35 = vector.load %arg0[%34, %c0_11, %c0_12] : memref<8x2x576xf32, #tpu.memory_space<vmem>>, vector<1x2x576xf32>
    %36 = vector.shape_cast %35 : vector<1x2x576xf32> to vector<2x576xf32>
    %37 = vector.extract_strided_slice %36 {offsets = [0, 0], sizes = [2, 384], strides = [1, 1]} : vector<2x576xf32> to vector<2x384xf32>
    %38 = vector.extract_strided_slice %33 {offsets = [0, 0], sizes = [2, 384], strides = [1, 1]} : vector<2x576xf32> to vector<2x384xf32>
    %39 = arith.addf %37, %38 : vector<2x384xf32>
    %40 = arith.negf %39 : vector<2x384xf32>
    %41 = math.exp %40 : vector<2x384xf32>
    %cst_13 = arith.constant 1.000000e+00 : f32
    %42 = vector.broadcast %cst_13 : f32 to vector<2x384xf32>
    %43 = arith.addf %42, %41 : vector<2x384xf32>
    %44 = arith.divf %42, %43 : vector<2x384xf32>
    %45 = vector.extract_strided_slice %44 {offsets = [0, 0], sizes = [2, 192], strides = [1, 1]} : vector<2x384xf32> to vector<2x192xf32>
    %46 = vector.extract_strided_slice %44 {offsets = [0, 192], sizes = [2, 192], strides = [1, 1]} : vector<2x384xf32> to vector<2x192xf32>
    %47 = vector.extract_strided_slice %36 {offsets = [0, 384], sizes = [2, 192], strides = [1, 1]} : vector<2x576xf32> to vector<2x192xf32>
    %48 = vector.extract_strided_slice %33 {offsets = [0, 384], sizes = [2, 192], strides = [1, 1]} : vector<2x576xf32> to vector<2x192xf32>
    %49 = arith.addf %48, %2 : vector<2x192xf32>
    %50 = arith.mulf %45, %49 : vector<2x192xf32>
    %51 = arith.addf %47, %50 : vector<2x192xf32>
    %52 = math.tanh %51 : vector<2x192xf32>
    %cst_14 = arith.constant 1.000000e+00 : f32
    %53 = vector.broadcast %cst_14 : f32 to vector<2x192xf32>
    %54 = arith.subf %53, %46 : vector<2x192xf32>
    %55 = arith.mulf %54, %52 : vector<2x192xf32>
    %56 = arith.mulf %46, %30 : vector<2x192xf32>
    %57 = arith.addf %55, %56 : vector<2x192xf32>
    %c2_i32 = arith.constant 2 : i32
    %58 = arith.truncf %57 : vector<2x192xf32> to vector<2x192xbf16>
    %c0_15 = arith.constant 0 : index
    %c0_16 = arith.constant 0 : index
    %59 = vector.load %arg1[%c0_15, %c0_16] : memref<192x576xbf16, #tpu.memory_space<vmem>>, vector<192x576xbf16>
    %cst_17 = arith.constant dense<0.000000e+00> : vector<2x576xf32>
    %60 = tpu.matmul %58, %59, %cst_17 {dimension_numbers = #tpu.dot_dimension_numbers<[1], [0], [0], [1], [0, 0, 1, 1], [], []>} : vector<2x192xbf16>, vector<192x576xbf16>, vector<2x576xf32> -> vector<2x576xf32>
    %61 = arith.index_cast %c2_i32 : i32 to index
    %c0_18 = arith.constant 0 : index
    %c0_19 = arith.constant 0 : index
    %62 = vector.load %arg0[%61, %c0_18, %c0_19] : memref<8x2x576xf32, #tpu.memory_space<vmem>>, vector<1x2x576xf32>
    %63 = vector.shape_cast %62 : vector<1x2x576xf32> to vector<2x576xf32>
    %64 = vector.extract_strided_slice %63 {offsets = [0, 0], sizes = [2, 384], strides = [1, 1]} : vector<2x576xf32> to vector<2x384xf32>
    %65 = vector.extract_strided_slice %60 {offsets = [0, 0], sizes = [2, 384], strides = [1, 1]} : vector<2x576xf32> to vector<2x384xf32>
    %66 = arith.addf %64, %65 : vector<2x384xf32>
    %67 = arith.negf %66 : vector<2x384xf32>
    %68 = math.exp %67 : vector<2x384xf32>
    %cst_20 = arith.constant 1.000000e+00 : f32
    %69 = vector.broadcast %cst_20 : f32 to vector<2x384xf32>
    %70 = arith.addf %69, %68 : vector<2x384xf32>
    %71 = arith.divf %69, %70 : vector<2x384xf32>
    %72 = vector.extract_strided_slice %71 {offsets = [0, 0], sizes = [2, 192], strides = [1, 1]} : vector<2x384xf32> to vector<2x192xf32>
    %73 = vector.extract_strided_slice %71 {offsets = [0, 192], sizes = [2, 192], strides = [1, 1]} : vector<2x384xf32> to vector<2x192xf32>
    %74 = vector.extract_strided_slice %63 {offsets = [0, 384], sizes = [2, 192], strides = [1, 1]} : vector<2x576xf32> to vector<2x192xf32>
    %75 = vector.extract_strided_slice %60 {offsets = [0, 384], sizes = [2, 192], strides = [1, 1]} : vector<2x576xf32> to vector<2x192xf32>
    %76 = arith.addf %75, %2 : vector<2x192xf32>
    %77 = arith.mulf %72, %76 : vector<2x192xf32>
    %78 = arith.addf %74, %77 : vector<2x192xf32>
    %79 = math.tanh %78 : vector<2x192xf32>
    %cst_21 = arith.constant 1.000000e+00 : f32
    %80 = vector.broadcast %cst_21 : f32 to vector<2x192xf32>
    %81 = arith.subf %80, %73 : vector<2x192xf32>
    %82 = arith.mulf %81, %79 : vector<2x192xf32>
    %83 = arith.mulf %73, %57 : vector<2x192xf32>
    %84 = arith.addf %82, %83 : vector<2x192xf32>
    %c3_i32 = arith.constant 3 : i32
    %85 = arith.truncf %84 : vector<2x192xf32> to vector<2x192xbf16>
    %c0_22 = arith.constant 0 : index
    %c0_23 = arith.constant 0 : index
    %86 = vector.load %arg1[%c0_22, %c0_23] : memref<192x576xbf16, #tpu.memory_space<vmem>>, vector<192x576xbf16>
    %cst_24 = arith.constant dense<0.000000e+00> : vector<2x576xf32>
    %87 = tpu.matmul %85, %86, %cst_24 {dimension_numbers = #tpu.dot_dimension_numbers<[1], [0], [0], [1], [0, 0, 1, 1], [], []>} : vector<2x192xbf16>, vector<192x576xbf16>, vector<2x576xf32> -> vector<2x576xf32>
    %88 = arith.index_cast %c3_i32 : i32 to index
    %c0_25 = arith.constant 0 : index
    %c0_26 = arith.constant 0 : index
    %89 = vector.load %arg0[%88, %c0_25, %c0_26] : memref<8x2x576xf32, #tpu.memory_space<vmem>>, vector<1x2x576xf32>
    %90 = vector.shape_cast %89 : vector<1x2x576xf32> to vector<2x576xf32>
    %91 = vector.extract_strided_slice %90 {offsets = [0, 0], sizes = [2, 384], strides = [1, 1]} : vector<2x576xf32> to vector<2x384xf32>
    %92 = vector.extract_strided_slice %87 {offsets = [0, 0], sizes = [2, 384], strides = [1, 1]} : vector<2x576xf32> to vector<2x384xf32>
    %93 = arith.addf %91, %92 : vector<2x384xf32>
    %94 = arith.negf %93 : vector<2x384xf32>
    %95 = math.exp %94 : vector<2x384xf32>
    %cst_27 = arith.constant 1.000000e+00 : f32
    %96 = vector.broadcast %cst_27 : f32 to vector<2x384xf32>
    %97 = arith.addf %96, %95 : vector<2x384xf32>
    %98 = arith.divf %96, %97 : vector<2x384xf32>
    %99 = vector.extract_strided_slice %98 {offsets = [0, 0], sizes = [2, 192], strides = [1, 1]} : vector<2x384xf32> to vector<2x192xf32>
    %100 = vector.extract_strided_slice %98 {offsets = [0, 192], sizes = [2, 192], strides = [1, 1]} : vector<2x384xf32> to vector<2x192xf32>
    %101 = vector.extract_strided_slice %90 {offsets = [0, 384], sizes = [2, 192], strides = [1, 1]} : vector<2x576xf32> to vector<2x192xf32>
    %102 = vector.extract_strided_slice %87 {offsets = [0, 384], sizes = [2, 192], strides = [1, 1]} : vector<2x576xf32> to vector<2x192xf32>
    %103 = arith.addf %102, %2 : vector<2x192xf32>
    %104 = arith.mulf %99, %103 : vector<2x192xf32>
    %105 = arith.addf %101, %104 : vector<2x192xf32>
    %106 = math.tanh %105 : vector<2x192xf32>
    %cst_28 = arith.constant 1.000000e+00 : f32
    %107 = vector.broadcast %cst_28 : f32 to vector<2x192xf32>
    %108 = arith.subf %107, %100 : vector<2x192xf32>
    %109 = arith.mulf %108, %106 : vector<2x192xf32>
    %110 = arith.mulf %100, %84 : vector<2x192xf32>
    %111 = arith.addf %109, %110 : vector<2x192xf32>
    %c4_i32 = arith.constant 4 : i32
    %112 = arith.truncf %111 : vector<2x192xf32> to vector<2x192xbf16>
    %c0_29 = arith.constant 0 : index
    %c0_30 = arith.constant 0 : index
    %113 = vector.load %arg1[%c0_29, %c0_30] : memref<192x576xbf16, #tpu.memory_space<vmem>>, vector<192x576xbf16>
    %cst_31 = arith.constant dense<0.000000e+00> : vector<2x576xf32>
    %114 = tpu.matmul %112, %113, %cst_31 {dimension_numbers = #tpu.dot_dimension_numbers<[1], [0], [0], [1], [0, 0, 1, 1], [], []>} : vector<2x192xbf16>, vector<192x576xbf16>, vector<2x576xf32> -> vector<2x576xf32>
    %115 = arith.index_cast %c4_i32 : i32 to index
    %c0_32 = arith.constant 0 : index
    %c0_33 = arith.constant 0 : index
    %116 = vector.load %arg0[%115, %c0_32, %c0_33] : memref<8x2x576xf32, #tpu.memory_space<vmem>>, vector<1x2x576xf32>
    %117 = vector.shape_cast %116 : vector<1x2x576xf32> to vector<2x576xf32>
    %118 = vector.extract_strided_slice %117 {offsets = [0, 0], sizes = [2, 384], strides = [1, 1]} : vector<2x576xf32> to vector<2x384xf32>
    %119 = vector.extract_strided_slice %114 {offsets = [0, 0], sizes = [2, 384], strides = [1, 1]} : vector<2x576xf32> to vector<2x384xf32>
    %120 = arith.addf %118, %119 : vector<2x384xf32>
    %121 = arith.negf %120 : vector<2x384xf32>
    %122 = math.exp %121 : vector<2x384xf32>
    %cst_34 = arith.constant 1.000000e+00 : f32
    %123 = vector.broadcast %cst_34 : f32 to vector<2x384xf32>
    %124 = arith.addf %123, %122 : vector<2x384xf32>
    %125 = arith.divf %123, %124 : vector<2x384xf32>
    %126 = vector.extract_strided_slice %125 {offsets = [0, 0], sizes = [2, 192], strides = [1, 1]} : vector<2x384xf32> to vector<2x192xf32>
    %127 = vector.extract_strided_slice %125 {offsets = [0, 192], sizes = [2, 192], strides = [1, 1]} : vector<2x384xf32> to vector<2x192xf32>
    %128 = vector.extract_strided_slice %117 {offsets = [0, 384], sizes = [2, 192], strides = [1, 1]} : vector<2x576xf32> to vector<2x192xf32>
    %129 = vector.extract_strided_slice %114 {offsets = [0, 384], sizes = [2, 192], strides = [1, 1]} : vector<2x576xf32> to vector<2x192xf32>
    %130 = arith.addf %129, %2 : vector<2x192xf32>
    %131 = arith.mulf %126, %130 : vector<2x192xf32>
    %132 = arith.addf %128, %131 : vector<2x192xf32>
    %133 = math.tanh %132 : vector<2x192xf32>
    %cst_35 = arith.constant 1.000000e+00 : f32
    %134 = vector.broadcast %cst_35 : f32 to vector<2x192xf32>
    %135 = arith.subf %134, %127 : vector<2x192xf32>
    %136 = arith.mulf %135, %133 : vector<2x192xf32>
    %137 = arith.mulf %127, %111 : vector<2x192xf32>
    %138 = arith.addf %136, %137 : vector<2x192xf32>
    %c5_i32 = arith.constant 5 : i32
    %139 = arith.truncf %138 : vector<2x192xf32> to vector<2x192xbf16>
    %c0_36 = arith.constant 0 : index
    %c0_37 = arith.constant 0 : index
    %140 = vector.load %arg1[%c0_36, %c0_37] : memref<192x576xbf16, #tpu.memory_space<vmem>>, vector<192x576xbf16>
    %cst_38 = arith.constant dense<0.000000e+00> : vector<2x576xf32>
    %141 = tpu.matmul %139, %140, %cst_38 {dimension_numbers = #tpu.dot_dimension_numbers<[1], [0], [0], [1], [0, 0, 1, 1], [], []>} : vector<2x192xbf16>, vector<192x576xbf16>, vector<2x576xf32> -> vector<2x576xf32>
    %142 = arith.index_cast %c5_i32 : i32 to index
    %c0_39 = arith.constant 0 : index
    %c0_40 = arith.constant 0 : index
    %143 = vector.load %arg0[%142, %c0_39, %c0_40] : memref<8x2x576xf32, #tpu.memory_space<vmem>>, vector<1x2x576xf32>
    %144 = vector.shape_cast %143 : vector<1x2x576xf32> to vector<2x576xf32>
    %145 = vector.extract_strided_slice %144 {offsets = [0, 0], sizes = [2, 384], strides = [1, 1]} : vector<2x576xf32> to vector<2x384xf32>
    %146 = vector.extract_strided_slice %141 {offsets = [0, 0], sizes = [2, 384], strides = [1, 1]} : vector<2x576xf32> to vector<2x384xf32>
    %147 = arith.addf %145, %146 : vector<2x384xf32>
    %148 = arith.negf %147 : vector<2x384xf32>
    %149 = math.exp %148 : vector<2x384xf32>
    %cst_41 = arith.constant 1.000000e+00 : f32
    %150 = vector.broadcast %cst_41 : f32 to vector<2x384xf32>
    %151 = arith.addf %150, %149 : vector<2x384xf32>
    %152 = arith.divf %150, %151 : vector<2x384xf32>
    %153 = vector.extract_strided_slice %152 {offsets = [0, 0], sizes = [2, 192], strides = [1, 1]} : vector<2x384xf32> to vector<2x192xf32>
    %154 = vector.extract_strided_slice %152 {offsets = [0, 192], sizes = [2, 192], strides = [1, 1]} : vector<2x384xf32> to vector<2x192xf32>
    %155 = vector.extract_strided_slice %144 {offsets = [0, 384], sizes = [2, 192], strides = [1, 1]} : vector<2x576xf32> to vector<2x192xf32>
    %156 = vector.extract_strided_slice %141 {offsets = [0, 384], sizes = [2, 192], strides = [1, 1]} : vector<2x576xf32> to vector<2x192xf32>
    %157 = arith.addf %156, %2 : vector<2x192xf32>
    %158 = arith.mulf %153, %157 : vector<2x192xf32>
    %159 = arith.addf %155, %158 : vector<2x192xf32>
    %160 = math.tanh %159 : vector<2x192xf32>
    %cst_42 = arith.constant 1.000000e+00 : f32
    %161 = vector.broadcast %cst_42 : f32 to vector<2x192xf32>
    %162 = arith.subf %161, %154 : vector<2x192xf32>
    %163 = arith.mulf %162, %160 : vector<2x192xf32>
    %164 = arith.mulf %154, %138 : vector<2x192xf32>
    %165 = arith.addf %163, %164 : vector<2x192xf32>
    %c6_i32 = arith.constant 6 : i32
    %166 = arith.truncf %165 : vector<2x192xf32> to vector<2x192xbf16>
    %c0_43 = arith.constant 0 : index
    %c0_44 = arith.constant 0 : index
    %167 = vector.load %arg1[%c0_43, %c0_44] : memref<192x576xbf16, #tpu.memory_space<vmem>>, vector<192x576xbf16>
    %cst_45 = arith.constant dense<0.000000e+00> : vector<2x576xf32>
    %168 = tpu.matmul %166, %167, %cst_45 {dimension_numbers = #tpu.dot_dimension_numbers<[1], [0], [0], [1], [0, 0, 1, 1], [], []>} : vector<2x192xbf16>, vector<192x576xbf16>, vector<2x576xf32> -> vector<2x576xf32>
    %169 = arith.index_cast %c6_i32 : i32 to index
    %c0_46 = arith.constant 0 : index
    %c0_47 = arith.constant 0 : index
    %170 = vector.load %arg0[%169, %c0_46, %c0_47] : memref<8x2x576xf32, #tpu.memory_space<vmem>>, vector<1x2x576xf32>
    %171 = vector.shape_cast %170 : vector<1x2x576xf32> to vector<2x576xf32>
    %172 = vector.extract_strided_slice %171 {offsets = [0, 0], sizes = [2, 384], strides = [1, 1]} : vector<2x576xf32> to vector<2x384xf32>
    %173 = vector.extract_strided_slice %168 {offsets = [0, 0], sizes = [2, 384], strides = [1, 1]} : vector<2x576xf32> to vector<2x384xf32>
    %174 = arith.addf %172, %173 : vector<2x384xf32>
    %175 = arith.negf %174 : vector<2x384xf32>
    %176 = math.exp %175 : vector<2x384xf32>
    %cst_48 = arith.constant 1.000000e+00 : f32
    %177 = vector.broadcast %cst_48 : f32 to vector<2x384xf32>
    %178 = arith.addf %177, %176 : vector<2x384xf32>
    %179 = arith.divf %177, %178 : vector<2x384xf32>
    %180 = vector.extract_strided_slice %179 {offsets = [0, 0], sizes = [2, 192], strides = [1, 1]} : vector<2x384xf32> to vector<2x192xf32>
    %181 = vector.extract_strided_slice %179 {offsets = [0, 192], sizes = [2, 192], strides = [1, 1]} : vector<2x384xf32> to vector<2x192xf32>
    %182 = vector.extract_strided_slice %171 {offsets = [0, 384], sizes = [2, 192], strides = [1, 1]} : vector<2x576xf32> to vector<2x192xf32>
    %183 = vector.extract_strided_slice %168 {offsets = [0, 384], sizes = [2, 192], strides = [1, 1]} : vector<2x576xf32> to vector<2x192xf32>
    %184 = arith.addf %183, %2 : vector<2x192xf32>
    %185 = arith.mulf %180, %184 : vector<2x192xf32>
    %186 = arith.addf %182, %185 : vector<2x192xf32>
    %187 = math.tanh %186 : vector<2x192xf32>
    %cst_49 = arith.constant 1.000000e+00 : f32
    %188 = vector.broadcast %cst_49 : f32 to vector<2x192xf32>
    %189 = arith.subf %188, %181 : vector<2x192xf32>
    %190 = arith.mulf %189, %187 : vector<2x192xf32>
    %191 = arith.mulf %181, %165 : vector<2x192xf32>
    %192 = arith.addf %190, %191 : vector<2x192xf32>
    %c7_i32 = arith.constant 7 : i32
    %193 = arith.truncf %192 : vector<2x192xf32> to vector<2x192xbf16>
    %c0_50 = arith.constant 0 : index
    %c0_51 = arith.constant 0 : index
    %194 = vector.load %arg1[%c0_50, %c0_51] : memref<192x576xbf16, #tpu.memory_space<vmem>>, vector<192x576xbf16>
    %cst_52 = arith.constant dense<0.000000e+00> : vector<2x576xf32>
    %195 = tpu.matmul %193, %194, %cst_52 {dimension_numbers = #tpu.dot_dimension_numbers<[1], [0], [0], [1], [0, 0, 1, 1], [], []>} : vector<2x192xbf16>, vector<192x576xbf16>, vector<2x576xf32> -> vector<2x576xf32>
    %196 = arith.index_cast %c7_i32 : i32 to index
    %c0_53 = arith.constant 0 : index
    %c0_54 = arith.constant 0 : index
    %197 = vector.load %arg0[%196, %c0_53, %c0_54] : memref<8x2x576xf32, #tpu.memory_space<vmem>>, vector<1x2x576xf32>
    %198 = vector.shape_cast %197 : vector<1x2x576xf32> to vector<2x576xf32>
    %199 = vector.extract_strided_slice %198 {offsets = [0, 0], sizes = [2, 384], strides = [1, 1]} : vector<2x576xf32> to vector<2x384xf32>
    %200 = vector.extract_strided_slice %195 {offsets = [0, 0], sizes = [2, 384], strides = [1, 1]} : vector<2x576xf32> to vector<2x384xf32>
    %201 = arith.addf %199, %200 : vector<2x384xf32>
    %202 = arith.negf %201 : vector<2x384xf32>
    %203 = math.exp %202 : vector<2x384xf32>
    %cst_55 = arith.constant 1.000000e+00 : f32
    %204 = vector.broadcast %cst_55 : f32 to vector<2x384xf32>
    %205 = arith.addf %204, %203 : vector<2x384xf32>
    %206 = arith.divf %204, %205 : vector<2x384xf32>
    %207 = vector.extract_strided_slice %206 {offsets = [0, 0], sizes = [2, 192], strides = [1, 1]} : vector<2x384xf32> to vector<2x192xf32>
    %208 = vector.extract_strided_slice %206 {offsets = [0, 192], sizes = [2, 192], strides = [1, 1]} : vector<2x384xf32> to vector<2x192xf32>
    %209 = vector.extract_strided_slice %198 {offsets = [0, 384], sizes = [2, 192], strides = [1, 1]} : vector<2x576xf32> to vector<2x192xf32>
    %210 = vector.extract_strided_slice %195 {offsets = [0, 384], sizes = [2, 192], strides = [1, 1]} : vector<2x576xf32> to vector<2x192xf32>
    %211 = arith.addf %210, %2 : vector<2x192xf32>
    %212 = arith.mulf %207, %211 : vector<2x192xf32>
    %213 = arith.addf %209, %212 : vector<2x192xf32>
    %214 = math.tanh %213 : vector<2x192xf32>
    %cst_56 = arith.constant 1.000000e+00 : f32
    %215 = vector.broadcast %cst_56 : f32 to vector<2x192xf32>
    %216 = arith.subf %215, %208 : vector<2x192xf32>
    %217 = arith.mulf %216, %214 : vector<2x192xf32>
    %218 = arith.mulf %208, %192 : vector<2x192xf32>
    %219 = arith.addf %217, %218 : vector<2x192xf32>
    %c8_i32 = arith.constant 8 : i32
    %220 = arith.truncf %219 : vector<2x192xf32> to vector<2x192xbf16>
    %c0_57 = arith.constant 0 : index
    %c0_58 = arith.constant 0 : index
    %221 = vector.load %arg3[%c0_57, %c0_58] : memref<192x64xbf16, #tpu.memory_space<vmem>>, vector<192x64xbf16>
    %cst_59 = arith.constant dense<0.000000e+00> : vector<2x64xf32>
    %222 = tpu.matmul %220, %221, %cst_59 {dimension_numbers = #tpu.dot_dimension_numbers<[1], [0], [0], [1], [0, 0, 1, 1], [], []>} : vector<2x192xbf16>, vector<192x64xbf16>, vector<2x64xf32> -> vector<2x64xf32>
    %c0_60 = arith.constant 0 : index
    %c0_61 = arith.constant 0 : index
    %223 = vector.load %arg4[%c0_60, %c0_61] : memref<2x64xf32, #tpu.memory_space<vmem>>, vector<2x64xf32>
    %224 = arith.addf %222, %223 : vector<2x64xf32>
    %c0_62 = arith.constant 0 : index
    %c0_63 = arith.constant 0 : index
    %225 = vector.load %arg5[%c0_62, %c0_63] : memref<1x64xf32, #tpu.memory_space<vmem>>, vector<1x64xf32>
    %226 = vector.broadcast %225 : vector<1x64xf32> to vector<2x64xf32>
    %227 = arith.mulf %224, %226 : vector<2x64xf32>
    %c0_64 = arith.constant 0 : index
    %c0_65 = arith.constant 0 : index
    %228 = vector.load %arg6[%c0_64, %c0_65] : memref<1x64xf32, #tpu.memory_space<vmem>>, vector<1x64xf32>
    %229 = vector.broadcast %228 : vector<1x64xf32> to vector<2x64xf32>
    %230 = arith.addf %227, %229 : vector<2x64xf32>
    %cst_66 = arith.constant 0.000000e+00 : f32
    %231 = vector.broadcast %cst_66 : f32 to vector<2x64xf32>
    %232 = arith.maximumf %230, %231 : vector<2x64xf32>
    %233 = arith.truncf %232 : vector<2x64xf32> to vector<2x64xbf16>
    %c0_67 = arith.constant 0 : index
    %c0_68 = arith.constant 0 : index
    %234 = vector.load %arg7[%c0_67, %c0_68] : memref<64x64xbf16, #tpu.memory_space<vmem>>, vector<64x64xbf16>
    %cst_69 = arith.constant dense<0.000000e+00> : vector<2x64xf32>
    %235 = tpu.matmul %233, %234, %cst_69 {dimension_numbers = #tpu.dot_dimension_numbers<[1], [0], [0], [1], [0, 0, 1, 1], [], []>} : vector<2x64xbf16>, vector<64x64xbf16>, vector<2x64xf32> -> vector<2x64xf32>
    %c0_70 = arith.constant 0 : index
    %c0_71 = arith.constant 0 : index
    %236 = vector.load %arg8[%c0_70, %c0_71] : memref<1x64xf32, #tpu.memory_space<vmem>>, vector<1x64xf32>
    %237 = vector.broadcast %236 : vector<1x64xf32> to vector<2x64xf32>
    %238 = arith.addf %235, %237 : vector<2x64xf32>
    %c0_72 = arith.constant 0 : index
    %c0_73 = arith.constant 0 : index
    %239 = vector.load %arg9[%c0_72, %c0_73] : memref<1x64xf32, #tpu.memory_space<vmem>>, vector<1x64xf32>
    %240 = vector.broadcast %239 : vector<1x64xf32> to vector<2x64xf32>
    %241 = arith.mulf %238, %240 : vector<2x64xf32>
    %c0_74 = arith.constant 0 : index
    %c0_75 = arith.constant 0 : index
    %242 = vector.load %arg10[%c0_74, %c0_75] : memref<1x64xf32, #tpu.memory_space<vmem>>, vector<1x64xf32>
    %243 = vector.broadcast %242 : vector<1x64xf32> to vector<2x64xf32>
    %244 = arith.addf %241, %243 : vector<2x64xf32>
    %cst_76 = arith.constant 0.000000e+00 : f32
    %245 = vector.broadcast %cst_76 : f32 to vector<2x64xf32>
    %246 = arith.maximumf %244, %245 : vector<2x64xf32>
    %247 = arith.truncf %246 : vector<2x64xf32> to vector<2x64xbf16>
    %c0_77 = arith.constant 0 : index
    %c0_78 = arith.constant 0 : index
    %248 = vector.load %arg11[%c0_77, %c0_78] : memref<64x4xbf16, #tpu.memory_space<vmem>>, vector<64x4xbf16>
    %cst_79 = arith.constant dense<0.000000e+00> : vector<2x4xf32>
    %249 = tpu.matmul %247, %248, %cst_79 {dimension_numbers = #tpu.dot_dimension_numbers<[1], [0], [0], [1], [0, 0, 1, 1], [], []>} : vector<2x64xbf16>, vector<64x4xbf16>, vector<2x4xf32> -> vector<2x4xf32>
    %c0_80 = arith.constant 0 : index
    %c0_81 = arith.constant 0 : index
    %250 = vector.load %arg12[%c0_80, %c0_81] : memref<1x4xf32, #tpu.memory_space<vmem>>, vector<1x4xf32>
    %251 = vector.broadcast %250 : vector<1x4xf32> to vector<2x4xf32>
    %252 = arith.addf %249, %251 : vector<2x4xf32>
    %c0_82 = arith.constant 0 : index
    %c0_83 = arith.constant 0 : index
    %253 = vector.load %arg13[%c0_82, %c0_83] : memref<2x4xf32, #tpu.memory_space<vmem>>, vector<2x4xf32>
    tpu.vector_store %arg13[%c0_82, %c0_83], %252 {strides = array<i32>} : memref<2x4xf32, #tpu.memory_space<vmem>>, vector<2x4xf32>,
    return
  }
}

</mosaic_0001>

<bundles_post_ra>
// kernel: tpu_custom_call.1
= control target key start
LH: loop header
LB: loop body
LE: loop exit
PB: predicated region body
PF: predicated region fallthrough
CT: control target
= control target key end

     0   :  { %18 = vsyncpa [#allocation3], 0  ;;  %s4078_s0 = inlined_call_operand.vmem [shape: f32[8,2,576], index: 0, kind: input, shape index: {}]   ;;  %s4079_s1 = inlined_call_operand.hbm [shape: bf16[192,576], index: 1, kind: input, shape index: {}]   ;;  %s4080_s2 = inlined_call_operand.vmem [shape: f32[1,192], index: 2, kind: input, shape index: {}]   ;;  %s4081_s3 = inlined_call_operand.vmem [shape: bf16[192,64], index: 3, kind: input, shape index: {}]   ;;  %s4082_s4 = inlined_call_operand.vmem [shape: f32[2,64], index: 4, kind: input, shape index: {}]   ;;  %s4083_s5 = inlined_call_operand.vmem [shape: f32[1,64], index: 5, kind: input, shape index: {}]   ;;  %s4084_s6 = inlined_call_operand.vmem [shape: f32[1,64], index: 6, kind: input, shape index: {}]   ;;  %s4085_s7 = inlined_call_operand.vmem [shape: bf16[64,64], index: 7, kind: input, shape index: {}]   ;;  %s4086_s8 = inlined_call_operand.vmem [shape: f32[1,64], index: 8, kind: input, shape index: {}]   ;;  %s4087_s9 = inlined_call_operand.vmem [shape: f32[1,64], index: 9, kind: input, shape index: {}]   ;;  %s4088_s10 = inlined_call_operand.vmem [shape: f32[1,64], index: 10, kind: input, shape index: {}]   ;;  %s4089_s11 = inlined_call_operand.vmem [shape: bf16[64,4], index: 11, kind: input, shape index: {}]   ;;  %s4090_s12 = inlined_call_operand.vmem [shape: f32[1,4], index: 12, kind: input, shape index: {}]   ;;  %s4091_s13 = inlined_call_operand.hbm [shape: f32[2,4], index: 13, kind: output, shape index: {}]  }
   0x1   :  { %19 = vsyncpa [#allocation4], 0  ;;  %s2857_s25 = smov [#allocation2]   ;;  %s2809_s29 = scalar_lea.hbm %s4079_s1, 7680 }
   0x2   :  { %s27_s26 = sshll.u32 %s2857_s25, 4  ;;  %p2810_p0 = scmp.ne.s32.totalorder %s4079_s1, %s2809_s29  ;;  %s28_s26 = int_to_ptr.vmem [resolvable:$true] %s27_s26 }
   0x3   :  { %p2813_p1 = scmp.lt.u32.totalorder %s2809_s29, %s4079_s1 }
   0x5   :  { %p2815_p2 = pnand %p2813_p1, %p2810_p0 }
   0x7   :  { %2818 = shalt.err (!%p2815_p2)
}
   0x8   :  { %s2819_s17 = scalar_lea.vmem %s28_s26, 7680  ;;  %p2824_p4 = scmp.lt.s32.totalorder %s28_s26, %s28_s26 }
   0x9   :  { %p2820_p3 = scmp.ne.s32.totalorder %s28_s26, %s2819_s17  ;;  %p2825_p5 = scmp.lt.s32.totalorder %s2819_s17, %s2819_s17 }
   0xb   :  { %p2826_p6 = por %p2825_p5, %p2824_p4 }
   0xd   :  { %p2827_p7 = pnand %p2826_p6, %p2820_p3 }
   0xf   :  { %2830 = shalt.err (!%p2827_p7)
}
  0x10   :  { %s2858_s18 = smov 320   ;;  %s2859_s19 = smov 20  }
  0x11   :  { %33 = dma.hbm_to_vmem [thread:$0]  %s4079_s1, 7680, %s28_s26, [#allocation3], %s2858_s18, %s2858_s18, %s2859_s19  }
  0x12   :  { %2853 = dma.done.wait [#allocation3], 7680  }
  0x13   :  { %2854 = vsyncadd [#allocation3], 4294959616  ;;  %v4092_v0 = vmov 0   ;;  %v2950_v1 = vld [vmem:[#allocation2 + $0x4] ss:$20 sps:$4 sm:$0xff]   ;;  %v62_v63 = vlaneseq  ;;  %s2862_s23 = smov 64  }
  0x14   :  { %492 = vmatprep.mubr.bf16.mxu0 %v4092_v0  ;;  %533 = vmatprep.mubr.bf16.mxu1 %v4092_v0  ;;  %4164 = vst [vmem:[#allocation8_spill] sm:$0xff] %v2950_v1  ;;  %v2952_v2 = vld [vmem:[#allocation2 + $0xc] ss:$20 sps:$4 sm:$0xff]   ;;  %v2957_v4 = vld [vmem:[#allocation2 + $0x8] ss:$20 sps:$4 sm:$0xff]   ;;  %vm629_vm0 = vcmask 1041408  }
  0x15   :  { %460 = vmatprep.subr.bf16.mxu0 %v2950_v1  ;;  %v2955_v3 = vld [vmem:[#allocation2] ss:$20 sps:$4 sm:$0xff]   ;;  %501 = vmatprep.subr.bf16.mxu1 %v2952_v2  ;;  %v2966_v7 = vld [vmem:[#allocation2 + $0x28] ss:$20 sps:$4 sm:$0xff]   ;;  %v2969_v8 = vld [vmem:[#allocation2 + $0x30] ss:$20 sps:$4 sm:$0xff]  }
  0x16   :  { %v2960_v5 = vld [vmem:[#allocation2 + $0x2c] ss:$20 sps:$4 sm:$0xff]   ;;  %461 = vmatpush1.bf16.msra.mxu0 %v2955_v3  ;;  %502 = vmatpush1.bf16.msra.mxu1 %v2957_v4  ;;  %v2964_v6 = vld [vmem:[#allocation2 + $0x34] ss:$20 sps:$4 sm:$0xff]   ;;  %v2974_v10 = vld [vmem:[#allocation2 + $0x5c] ss:$20 sps:$4 sm:$0xff]  }
  0x17   :  { %462 = vmatprep.subr.bf16.mxu0 %v2960_v5  ;;  %503 = vmatprep.subr.bf16.mxu1 %v2964_v6  ;;  %v2972_v9 = vld [vmem:[#allocation2 + $0x54] ss:$20 sps:$4 sm:$0xff]   ;;  %v2976_v11 = vld [vmem:[#allocation2 + $0x50] ss:$20 sps:$4 sm:$0xff]   ;;  %v2978_v12 = vld [vmem:[#allocation2 + $0x58] ss:$20 sps:$4 sm:$0xff]  }
  0x18   :  { %v2982_v13 = vld [vmem:[#allocation2 + $0x7c] ss:$20 sps:$4 sm:$0xff]   ;;  %v2986_v14 = vld [vmem:[#allocation2 + $0x84] ss:$20 sps:$4 sm:$0xff]   ;;  %v2992_v16 = vld [vmem:[#allocation2 + $0x80] ss:$20 sps:$4 sm:$0xff]  }
  0x19   :  { %v2988_v15 = vld [vmem:[#allocation2 + $0x78] ss:$20 sps:$4 sm:$0xff]   ;;  %v3000_v19 = vld [vmem:[#allocation2 + $0xa0] ss:$20 sps:$4 sm:$0xff]   ;;  %v3002_v20 = vld [vmem:[#allocation2 + $0xa8] ss:$20 sps:$4 sm:$0xff]  }
  0x1a   :  { %463 = vmatpush1.bf16.msra.mxu0 %v2966_v7  ;;  %504 = vmatpush1.bf16.msra.mxu1 %v2969_v8  ;;  %v2994_v17 = vld [vmem:[#allocation2 + $0xa4] ss:$20 sps:$4 sm:$0xff]   ;;  %v2998_v18 = vld [vmem:[#allocation2 + $0xac] ss:$20 sps:$4 sm:$0xff]   ;;  %4165 = vst [vmem:[#allocation9_spill] sm:$0xff] %v3002_v20  ;;  %vm456_vm1 = vcmask 523264  }
  0x1b   :  { %464 = vmatprep.subr.bf16.mxu0 %v2972_v9  ;;  %505 = vmatprep.subr.bf16.mxu1 %v2974_v10  ;;  %v3006_v21 = vld [vmem:[#allocation2 + $0xcc] ss:$20 sps:$4 sm:$0xff]   ;;  %v3010_v22 = vld [vmem:[#allocation2 + $0xd4] ss:$20 sps:$4 sm:$0xff]   ;;  %v3016_v24 = vld [vmem:[#allocation2 + $0xd0] ss:$20 sps:$4 sm:$0xff]  }
  0x1c   :  { %4166 = vst [vmem:[#allocation10_spill] sm:$0xff] %v3010_v22  ;;  %v3012_v23 = vld [vmem:[#allocation2 + $0xc8] ss:$20 sps:$4 sm:$0xff]   ;;  %4167 = vst [vmem:[#allocation11_spill] sm:$0xff] %v3016_v24  ;;  %v3024_v27 = vld [vmem:[#allocation2 + $0xf0] ss:$20 sps:$4 sm:$0xff]  }
  0x1d   :  { %v3018_v25 = vld [vmem:[#allocation2 + $0xf4] ss:$20 sps:$4 sm:$0xff]   ;;  %v3022_v26 = vld [vmem:[#allocation2 + $0xfc] ss:$20 sps:$4 sm:$0xff]   ;;  %v3026_v28 = vld [vmem:[#allocation2 + $0xf8] ss:$20 sps:$4 sm:$0xff]  }
  0x1e   :  { %465 = vmatpush1.bf16.msra.mxu0 %v2976_v11  ;;  %506 = vmatpush1.bf16.msra.mxu1 %v2978_v12  ;;  %4168 = vst [vmem:[#allocation12_spill] sm:$0xff] %v3022_v26  ;;  %4169 = vst [vmem:[#allocation13_spill] sm:$0xff] %v3026_v28  ;;  %v3030_v29 = vld [vmem:[#allocation2 + $0x11c] ss:$20 sps:$4 sm:$0xff]   ;;  %v3034_v30 = vld [vmem:[#allocation2 + $0x124] ss:$20 sps:$4 sm:$0xff]  }
  0x1f   :  { %466 = vmatprep.subr.bf16.mxu0 %v2982_v13  ;;  %507 = vmatprep.subr.bf16.mxu1 %v2986_v14  ;;  %4170 = vst [vmem:[#allocation14_spill] sm:$0xff] %v3034_v30  ;;  %v3036_v31 = vld [vmem:[#allocation2 + $0x118] ss:$20 sps:$4 sm:$0xff]   ;;  %v3040_v32 = vld [vmem:[#allocation2 + $0x120] ss:$20 sps:$4 sm:$0xff]   ;;  %vm2864_vm2 = vmmov 0  }
  0x20   :  { %4171 = vst [vmem:[#allocation15_spill] sm:$0xff] %v3040_v32  ;;  %v3042_v33 = vld [vmem:[#allocation2 + $0x144] ss:$20 sps:$4 sm:$0xff]   ;;  %v3046_v34 = vld [vmem:[#allocation2 + $0x14c] ss:$20 sps:$4 sm:$0xff]   ;;  %s2865_s26 = smov [#allocation5]  }
  0x21   :  { %4172 = vst [vmem:[#allocation16_spill] sm:$0xff] %v3046_v34  ;;  %v3048_v35 = vld [vmem:[#allocation2 + $0x140] ss:$20 sps:$4 sm:$0xff]   ;;  %v3050_v36 = vld [vmem:[#allocation2 + $0x148] ss:$20 sps:$4 sm:$0xff]   ;;  %vm2405_vm3 = vcmask 25600  }
  0x22   :  { %467 = vmatpush1.bf16.msra.mxu0 %v2988_v15  ;;  %508 = vmatpush1.bf16.msra.mxu1 %v2992_v16  ;;  %4173 = vst [vmem:[#allocation17_spill] sm:$0xff] %v3050_v36  ;;  %v3054_v37 = vld [vmem:[#allocation2 + $0x16c] ss:$20 sps:$4 sm:$0xff]   ;;  %v3058_v38 = vld [vmem:[#allocation2 + $0x174] ss:$20 sps:$4 sm:$0xff]  }
  0x23   :  { %468 = vmatprep.subr.bf16.mxu0 %v2994_v17  ;;  %509 = vmatprep.subr.bf16.mxu1 %v2998_v18  ;;  %4174 = vst [vmem:[#allocation18_spill] sm:$0xff] %v3058_v38  ;;  %v3060_v39 = vld [vmem:[#allocation2 + $0x168] ss:$20 sps:$4 sm:$0xff]   ;;  %v3062_v40 = vld [vmem:[#allocation2 + $0x170] ss:$20 sps:$4 sm:$0xff]  }
  0x24   :  { %4175 = vst [vmem:[#allocation19_spill] sm:$0xff] %v3062_v40  ;;  %v3066_v41 = vld [vmem:[#allocation2 + $0x194] ss:$20 sps:$4 sm:$0xff]   ;;  %v3070_v42 = vld [vmem:[#allocation2 + $0x19c] ss:$20 sps:$4 sm:$0xff]  }
  0x25   :  { %4176 = vst [vmem:[#allocation20_spill] sm:$0xff] %v3070_v42  ;;  %v3072_v43 = vld [vmem:[#allocation2 + $0x190] ss:$20 sps:$4 sm:$0xff]   ;;  %v3074_v44 = vld [vmem:[#allocation2 + $0x198] ss:$20 sps:$4 sm:$0xff]  }
  0x26   :  { %469 = vmatpush1.bf16.msra.mxu0 %v3000_v19  ;;  %510 = vmatpush1.bf16.msra.mxu1 %v3002_v20  ;;  %4177 = vst [vmem:[#allocation21_spill] sm:$0xff] %v3074_v44  ;;  %v3078_v45 = vld [vmem:[#allocation2 + $0x1bc] ss:$20 sps:$4 sm:$0xff]   ;;  %v3082_v46 = vld [vmem:[#allocation2 + $0x1c4] ss:$20 sps:$4 sm:$0xff]  }
  0x27   :  { %470 = vmatprep.subr.bf16.mxu0 %v3006_v21  ;;  %511 = vmatprep.subr.bf16.mxu1 %v3010_v22  ;;  %4178 = vst [vmem:[#allocation22_spill] sm:$0xff] %v3082_v46  ;;  %v3084_v47 = vld [vmem:[#allocation2 + $0x1b8] ss:$20 sps:$4 sm:$0xff]   ;;  %v3086_v48 = vld [vmem:[#allocation2 + $0x1c0] ss:$20 sps:$4 sm:$0xff]  }
  0x28   :  { %4179 = vst [vmem:[#allocation23_spill] sm:$0xff] %v3086_v48  ;;  %v3092_v49 = vld [vmem:[#allocation2 + $0x10] ss:$20 sps:$4 sm:$0xff]   ;;  %v3098_v50 = vld [vmem:[#allocation2 + $0x38] ss:$20 sps:$4 sm:$0xff]  }
  0x29   :  { %v3106_v51 = vld [vmem:[#allocation2 + $0x60] ss:$20 sps:$4 sm:$0xff]   ;;  %v3114_v52 = vld [vmem:[#allocation2 + $0x88] ss:$20 sps:$4 sm:$0xff]   ;;  %v3120_v53 = vld [vmem:[#allocation2 + $0xb0] ss:$20 sps:$4 sm:$0xff]  }
  0x2a   :  { %471 = vmatpush1.bf16.msra.mxu0 %v3012_v23  ;;  %512 = vmatpush1.bf16.msra.mxu1 %v3016_v24  ;;  %v3126_v54 = vld [vmem:[#allocation2 + $0xd8] ss:$20 sps:$4 sm:$0xff]   ;;  %v3132_v55 = vld [vmem:[#allocation2 + $0x100] ss:$20 sps:$4 sm:$0xff]   ;;  %v3138_v56 = vld [vmem:[#allocation2 + $0x128] ss:$20 sps:$4 sm:$0xff]  }
  0x2b   :  { %472 = vmatprep.subr.bf16.mxu0 %v3018_v25  ;;  %513 = vmatprep.subr.bf16.mxu1 %v3022_v26  ;;  %v3144_v57 = vld [vmem:[#allocation2 + $0x150] ss:$20 sps:$4 sm:$0xff]   ;;  %v3150_v58 = vld [vmem:[#allocation2 + $0x178] ss:$20 sps:$4 sm:$0xff]   ;;  %v3156_v59 = vld [vmem:[#allocation2 + $0x1a0] ss:$20 sps:$4 sm:$0xff]  }
  0x2c   :  { %v3162_v60 = vld [vmem:[#allocation2 + $0x1c8] ss:$20 sps:$4 sm:$0xff]   ;;  %v2861_v61 = vmov 1983009808  }
  0x2d   :  { %v589_v62 = vunpack.c.l.s4 %v2861_v61  ;;  %v582_v61 = vld [vmem:[%s4078_s0] sm:$0xff] }
  0x2e   :  { %473 = vmatpush1.bf16.msra.mxu0 %v3024_v27  ;;  %514 = vmatpush1.bf16.msra.mxu1 %v3026_v28 }
  0x2f   :  { %474 = vmatprep.subr.bf16.mxu0 %v3030_v29  ;;  %515 = vmatprep.subr.bf16.mxu1 %v3034_v30 }
  0x32   :  { %475 = vmatpush1.bf16.msra.mxu0 %v3036_v31  ;;  %516 = vmatpush1.bf16.msra.mxu1 %v3040_v32 }
  0x33   :  { %476 = vmatprep.subr.bf16.mxu0 %v3042_v33  ;;  %517 = vmatprep.subr.bf16.mxu1 %v3046_v34 }
  0x36   :  { %477 = vmatpush1.bf16.msra.mxu0 %v3048_v35  ;;  %518 = vmatpush1.bf16.msra.mxu1 %v3050_v36 }
  0x37   :  { %478 = vmatprep.subr.bf16.mxu0 %v3054_v37  ;;  %519 = vmatprep.subr.bf16.mxu1 %v3058_v38 }
  0x3a   :  { %479 = vmatpush1.bf16.msra.mxu0 %v3060_v39  ;;  %520 = vmatpush1.bf16.msra.mxu1 %v3062_v40 }
  0x3b   :  { %480 = vmatprep.subr.bf16.mxu0 %v3066_v41  ;;  %521 = vmatprep.subr.bf16.mxu1 %v3070_v42 }
  0x3e   :  { %481 = vmatpush1.bf16.msra.mxu0 %v3072_v43  ;;  %522 = vmatpush1.bf16.msra.mxu1 %v3074_v44 }
  0x3f   :  { %482 = vmatprep.subr.bf16.mxu0 %v3078_v45  ;;  %523 = vmatprep.subr.bf16.mxu1 %v3082_v46 }
  0x42   :  { %483 = vmatpush1.bf16.msra.mxu0 %v3084_v47  ;;  %524 = vmatpush1.bf16.msra.mxu1 %v3086_v48 }
  0x43   :  { %542 = vmatprep.subr.bf16.mxu0 %v4092_v0  ;;  %661 = vmatprep.subr.bf16.mxu1 %v2950_v1 }
  0x45   :  { %493 = vmatmul.mubr.bf16.vlgmr.msra.gmra.mrb[0].mxu0 %v4092_v0  ;;  %534 = vmatmul.mubr.bf16.vlgmr.msra.gmra.mrb[0].mxu1 %v4092_v0 }
  0x46   :  { %543 = vmatpush1.bf16.msra.mxu0 %v3092_v49  ;;  %574 = vmatprep.mubr.bf16.mxu0 %v4092_v0 }
  0x47   :  { %544 = vmatprep.subr.bf16.mxu0 %v4092_v0  ;;  %662 = vmatpush1.bf16.msra.mxu1 %v2955_v3 }
  0x48   :  { %663 = vmatprep.subr.bf16.mxu1 %v2960_v5 }
  0x4a   :  { %545 = vmatpush1.bf16.msra.mxu0 %v3098_v50 }
  0x4b   :  { %546 = vmatprep.subr.bf16.mxu0 %v4092_v0  ;;  %664 = vmatpush1.bf16.msra.mxu1 %v2966_v7 }
  0x4c   :  { %665 = vmatprep.subr.bf16.mxu1 %v2972_v9 }
  0x4e   :  { %547 = vmatpush1.bf16.msra.mxu0 %v3106_v51 }
  0x4f   :  { %548 = vmatprep.subr.bf16.mxu0 %v4092_v0  ;;  %666 = vmatpush1.bf16.msra.mxu1 %v2976_v11 }
  0x50   :  { %667 = vmatprep.subr.bf16.mxu1 %v2982_v13 }
  0x52   :  { %549 = vmatpush1.bf16.msra.mxu0 %v3114_v52 }
  0x53   :  { %550 = vmatprep.subr.bf16.mxu0 %v4092_v0  ;;  %668 = vmatpush1.bf16.msra.mxu1 %v2988_v15 }
  0x54   :  { %669 = vmatprep.subr.bf16.mxu1 %v2994_v17 }
  0x56   :  { %551 = vmatpush1.bf16.msra.mxu0 %v3120_v53 }
  0x57   :  { %552 = vmatprep.subr.bf16.mxu0 %v4092_v0  ;;  %670 = vmatpush1.bf16.msra.mxu1 %v3000_v19 }
  0x58   :  { %671 = vmatprep.subr.bf16.mxu1 %v3006_v21 }
  0x5a   :  { %553 = vmatpush1.bf16.msra.mxu0 %v3126_v54 }
  0x5b   :  { %554 = vmatprep.subr.bf16.mxu0 %v4092_v0  ;;  %672 = vmatpush1.bf16.msra.mxu1 %v3012_v23 }
  0x5c   :  { %673 = vmatprep.subr.bf16.mxu1 %v3018_v25 }
  0x5e   :  { %555 = vmatpush1.bf16.msra.mxu0 %v3132_v55 }
  0x5f   :  { %556 = vmatprep.subr.bf16.mxu0 %v4092_v0  ;;  %674 = vmatpush1.bf16.msra.mxu1 %v3024_v27 }
  0x60   :  { %675 = vmatprep.subr.bf16.mxu1 %v3030_v29 }
  0x62   :  { %557 = vmatpush1.bf16.msra.mxu0 %v3138_v56 }
  0x63   :  { %558 = vmatprep.subr.bf16.mxu0 %v4092_v0  ;;  %676 = vmatpush1.bf16.msra.mxu1 %v3036_v31 }
  0x64   :  { %677 = vmatprep.subr.bf16.mxu1 %v3042_v33 }
  0x66   :  { %559 = vmatpush1.bf16.msra.mxu0 %v3144_v57 }
  0x67   :  { %560 = vmatprep.subr.bf16.mxu0 %v4092_v0  ;;  %678 = vmatpush1.bf16.msra.mxu1 %v3048_v35 }
  0x68   :  { %679 = vmatprep.subr.bf16.mxu1 %v3054_v37 }
  0x6a   :  { %561 = vmatpush1.bf16.msra.mxu0 %v3150_v58 }
  0x6b   :  { %562 = vmatprep.subr.bf16.mxu0 %v4092_v0  ;;  %680 = vmatpush1.bf16.msra.mxu1 %v3060_v39 }
  0x6c   :  { %681 = vmatprep.subr.bf16.mxu1 %v3066_v41 }
  0x6e   :  { %563 = vmatpush1.bf16.msra.mxu0 %v3156_v59 }
  0x6f   :  { %564 = vmatprep.subr.bf16.mxu0 %v4092_v0  ;;  %682 = vmatpush1.bf16.msra.mxu1 %v3072_v43 }
  0x70   :  { %683 = vmatprep.subr.bf16.mxu1 %v3078_v45 }
  0x72   :  { %565 = vmatpush1.bf16.msra.mxu0 %v3162_v60 }
  0x73   :  { %702 = vmatprep.subr.bf16.mxu0 %v2952_v2  ;;  %684 = vmatpush1.bf16.msra.mxu1 %v3084_v47 }
  0x74   :  { %743 = vmatprep.subr.bf16.mxu1 %v4092_v0 }
  0x75   :  { %575 = vmatmul.mubr.bf16.vlgmr.msra.gmra.mrb[4].mxu0 %v4092_v0  ;;  %v590_v0 = vunpack.c.0.s8 %v589_v62 }
  0x76   :  { %703 = vmatpush1.bf16.msra.mxu0 %v2957_v4 }
  0x77   :  { %704 = vmatprep.subr.bf16.mxu0 %v2964_v6 }
  0x7a   :  { %705 = vmatpush1.bf16.msra.mxu0 %v2969_v8 }
  0x7b   :  { %706 = vmatprep.subr.bf16.mxu0 %v2974_v10 }
  0x7e   :  { %707 = vmatpush1.bf16.msra.mxu0 %v2978_v12 }
  0x7f   :  { %708 = vmatprep.subr.bf16.mxu0 %v2986_v14 }
  0x82   :  { %709 = vmatpush1.bf16.msra.mxu0 %v2992_v16 }
  0x83   :  { %710 = vmatprep.subr.bf16.mxu0 %v2998_v18 }
  0x86   :  { %711 = vmatpush1.bf16.msra.mxu0 %v3002_v20 }
  0x87   :  { %712 = vmatprep.subr.bf16.mxu0 %v3010_v22 }
  0x8a   :  { %713 = vmatpush1.bf16.msra.mxu0 %v3016_v24 }
  0x8b   :  { %714 = vmatprep.subr.bf16.mxu0 %v3022_v26 }
  0x8e   :  { %715 = vmatpush1.bf16.msra.mxu0 %v3026_v28 }
  0x8f   :  { %716 = vmatprep.subr.bf16.mxu0 %v3034_v30 }
  0x92   :  { %717 = vmatpush1.bf16.msra.mxu0 %v3040_v32 }
  0x93   :  { %718 = vmatprep.subr.bf16.mxu0 %v3046_v34  ;;  %v63_v34 = vshrl.u32 %v62_v63, 7 }
  0x96   :  { %719 = vmatpush1.bf16.msra.mxu0 %v3050_v36  ;;  %v3196_v36 = vsub.s32 %v590_v0, %v63_v34 }
  0x97   :  { %720 = vmatprep.subr.bf16.mxu0 %v3058_v38 }
  0x9a   :  { %721 = vmatpush1.bf16.msra.mxu0 %v3062_v40 }
  0x9b   :  { %722 = vmatprep.subr.bf16.mxu0 %v3070_v42 }
  0x9e   :  { %723 = vmatpush1.bf16.msra.mxu0 %v3074_v44 }
  0x9f   :  { %724 = vmatprep.subr.bf16.mxu0 %v3082_v46 }
  0xa2   :  { %725 = vmatpush1.bf16.msra.mxu0 %v3086_v48 }
  0xa3   :  { %862 = vmatprep.subr.bf16.mxu0 %v2950_v1 }
 0x118   :  { %v494_v38 = vpop.f32.mrb[0].mxu0  ;;  %v535_v32 = vpop.f32.mrb[0].mxu1 }
 0x119   :  { %v496_v40 = vpop.f32.mrb[1].mxu0  ;;  %v537_v30 = vpop.f32.mrb[1].mxu1  ;;  %v601_v42 = vrot.slane %v535_v32, %v3196_v36  ;;  %v60_v32 = vld [vmem:[%s4080_s2] sm:$0x3] }
 0x11a   :  { %v587_v44 = vcombine.low %v494_v38, %v496_v40  ;;  %v498_v28 = vpop.f32.mrb[2].mxu0  ;;  %v539_v46 = vpop.f32.mrb[2].mxu1 }
 0x11b   :  { %v499_v26 = vpop.f32.mrb[3].mxu0  ;;  %v540_v48 = vpop.f32.mrb[3].mxu1  ;;  %v64_v28 = vsub.s32 0, %v63_v34 }
 0x11c   :  { %v594_v1 = vrot.slane %v587_v44, %v3196_v36  ;;  %v68_v26 = vsub.s32 1, %v63_v34 }
 0x11d   :  { %v3207_v38 = vrot.slane %v60_v32, %v64_v28 }
 0x11e   :  { %v602_v62 = vcombine.low %v594_v1, %v601_v42  ;;  %v3209_v40 = vrot.slane %v60_v32, %v68_v26 }
 0x11f   :  { %4180 = vst [vmem:[#allocation24_spill] sm:$0xff] %v3207_v38  ;;  %v611_v42 = vadd.f32 %v537_v30, %v3207_v38 }
 0x120   :  { %v604_v0 = vadd.f32 %v602_v62, %v582_v61 }
 0x122   :  { %v2482_v63 = vmul.f32 -1.442695, %v604_v0  ;;  %v583_v0 = vld [vmem:[%s4078_s0 + $0x8] sm:$0x3] }
 0x123   :  { %v628_v28 = vrot.slane %v583_v0, 6 }
 0x124   :  { %2701 = vpow2.f32 %v2482_v63  ;;  %v627_v63 = vrot.slane %v582_v61, 6 }
 0x126   :  { %v630_v26 = vsel %vm629_vm0, %v627_v63, %v628_v28  ;;  %v4183_v28 = vld [vmem:[#allocation10_spill] sm:$0xff] }
 0x12e   :  { %v2702_v24 = vpop.eup %2701 }
 0x12f   :  { %v608_v22 = vadd.f32 1.0, %v2702_v24 }
 0x131   :  { %2703 = vrcp.f32 %v608_v22 }
 0x13b   :  { %v2704_v20 = vpop.eup %2703 }
 0x13c   :  { %635 = vrot.lane.b32.xlu0 %v2704_v20, %s2862_s23 }
 0x148   :  { %v576_v1 = vpop.f32.mrb[4].mxu0 }
 0x149   :  { %v612_v24 = vadd.f32 %v576_v1, %v3209_v40  ;;  %v578_v22 = vpop.f32.mrb[5].mxu0 }
 0x14a   :  { %v579_v44 = vpop.f32.mrb[6].mxu0 }
 0x14b   :  { %v615_v46 = vcombine.low %v611_v42, %v612_v24  ;;  %v580_v48 = vpop.f32.mrb[7].mxu0 }
 0x14d   :  { %v622_v62 = vrot.slane %v615_v46, %v3196_v36 }
 0x14f   :  { %v624_v34 = vmul.f32 %v2704_v20, %v622_v62 }
 0x151   :  { %v632_v32 = vadd.f32 %v630_v26, %v624_v34  ;;  %v4181_v34 = vmov 0   ;;  %v4184_v26 = vld [vmem:[#allocation11_spill] sm:$0xff] }
 0x153   :  { %2705 = vtanh.f32 %v632_v32  ;;  %v4190_v32 = vld [vmem:[#allocation17_spill] sm:$0xff] }
 0x15d   :  { %v2706_v44 = vpop.eup %2705 }
 0x1ae   :  { %v636_v30 = vpop.permute.xlu0 %635 }
 0x1af   :  { %v637_v1 = vrot.slane %v636_v30, 2  ;;  %v638_v22 = vrot.slane %v636_v30, 4  ;;  %v4191_v30 = vld [vmem:[#allocation18_spill] sm:$0xff] }
 0x1b1   :  { %v639_v42 = vsel %vm456_vm1, %v637_v1, %v638_v22  ;;  %v4192_v1 = vld [vmem:[#allocation19_spill] sm:$0xff]  ;;  %v4193_v22 = vld [vmem:[#allocation20_spill] sm:$0xff] }
 0x1b2   :  { %v641_v24 = vsub.f32 1.0, %v639_v42  ;;  %v643_v46 = vmul.f32 0.0, %v639_v42  ;;  %v4194_v42 = vld [vmem:[#allocation21_spill] sm:$0xff] }
 0x1b4   :  { %v642_v20 = vmul.f32 %v2706_v44, %v641_v24  ;;  %v4195_v24 = vld [vmem:[#allocation22_spill] sm:$0xff]  ;;  %v4196_v44 = vld [vmem:[#allocation23_spill] sm:$0xff] }
 0x1b6   :  { %v3219_v48 = vadd.f32 %v643_v46, %v642_v20  ;;  %v4197_v20 = vld [vmem:[#allocation8_spill] sm:$0xff] }
 0x1b8   :  { %v652_v61 = vrot.slane %v3219_v48, %v3196_v36 }
 0x1ba   :  { %v653_v62 = vcombine.high %v652_v61, %v652_v61  ;;  %v656_v63 = vpack.c.bf16 %v652_v61, %v652_v61 }
 0x1bc   :  { %v657_v0 = vpack.c.bf16 %v653_v62, %v653_v62 }
 0x1be   :  { %2483 = vmatprep.mubr.msk.bf16.mxu1 %vm456_vm1, %v657_v0  ;;  %2484 = vmatprep.mubr.msk.bf16.mxu0 %vm456_vm1, %v657_v0 }
 0x1bf   :  { %694 = vmatmul.mubr.bf16.vlgmr.msra.gmra.mrb[4].mxu1 %v656_v63  ;;  %735 = vmatmul.mubr.bf16.vlgmr.msra.gmra.mrb[8].mxu0 %v656_v63 }
 0x1c0   :  { %744 = vmatpush1.bf16.msra.mxu1 %v3092_v49  ;;  %2485 = vmatprep.mubr.msk.bf16.mxu1 %vm456_vm1, %v657_v0 }
 0x1c1   :  { %745 = vmatprep.subr.bf16.mxu1 %v4181_v34  ;;  %863 = vmatpush1.bf16.msra.mxu0 %v2955_v3 }
 0x1c2   :  { %864 = vmatprep.subr.bf16.mxu0 %v2960_v5 }
 0x1c4   :  { %746 = vmatpush1.bf16.msra.mxu1 %v3098_v50 }
 0x1c5   :  { %747 = vmatprep.subr.bf16.mxu1 %v4181_v34  ;;  %865 = vmatpush1.bf16.msra.mxu0 %v2966_v7 }
 0x1c6   :  { %866 = vmatprep.subr.bf16.mxu0 %v2972_v9 }
 0x1c8   :  { %748 = vmatpush1.bf16.msra.mxu1 %v3106_v51 }
 0x1c9   :  { %749 = vmatprep.subr.bf16.mxu1 %v4181_v34  ;;  %867 = vmatpush1.bf16.msra.mxu0 %v2976_v11 }
 0x1ca   :  { %868 = vmatprep.subr.bf16.mxu0 %v2982_v13 }
 0x1cc   :  { %750 = vmatpush1.bf16.msra.mxu1 %v3114_v52 }
 0x1cd   :  { %751 = vmatprep.subr.bf16.mxu1 %v4181_v34  ;;  %869 = vmatpush1.bf16.msra.mxu0 %v2988_v15 }
 0x1ce   :  { %870 = vmatprep.subr.bf16.mxu0 %v2994_v17 }
 0x1d0   :  { %752 = vmatpush1.bf16.msra.mxu1 %v3120_v53 }
 0x1d1   :  { %753 = vmatprep.subr.bf16.mxu1 %v4181_v34  ;;  %871 = vmatpush1.bf16.msra.mxu0 %v3000_v19 }
 0x1d2   :  { %872 = vmatprep.subr.bf16.mxu0 %v3006_v21 }
 0x1d4   :  { %754 = vmatpush1.bf16.msra.mxu1 %v3126_v54 }
 0x1d5   :  { %755 = vmatprep.subr.bf16.mxu1 %v4181_v34  ;;  %873 = vmatpush1.bf16.msra.mxu0 %v3012_v23 }
 0x1d6   :  { %874 = vmatprep.subr.bf16.mxu0 %v3018_v25 }
 0x1d8   :  { %756 = vmatpush1.bf16.msra.mxu1 %v3132_v55 }
 0x1d9   :  { %757 = vmatprep.subr.bf16.mxu1 %v4181_v34  ;;  %875 = vmatpush1.bf16.msra.mxu0 %v3024_v27 }
 0x1da   :  { %876 = vmatprep.subr.bf16.mxu0 %v3030_v29 }
 0x1dc   :  { %758 = vmatpush1.bf16.msra.mxu1 %v3138_v56 }
 0x1dd   :  { %759 = vmatprep.subr.bf16.mxu1 %v4181_v34  ;;  %877 = vmatpush1.bf16.msra.mxu0 %v3036_v31 }
 0x1de   :  { %878 = vmatprep.subr.bf16.mxu0 %v3042_v33 }
 0x1e0   :  { %760 = vmatpush1.bf16.msra.mxu1 %v3144_v57 }
 0x1e1   :  { %761 = vmatprep.subr.bf16.mxu1 %v4181_v34  ;;  %879 = vmatpush1.bf16.msra.mxu0 %v3048_v35 }
 0x1e2   :  { %880 = vmatprep.subr.bf16.mxu0 %v3054_v37 }
 0x1e4   :  { %762 = vmatpush1.bf16.msra.mxu1 %v3150_v58 }
 0x1e5   :  { %763 = vmatprep.subr.bf16.mxu1 %v4181_v34  ;;  %881 = vmatpush1.bf16.msra.mxu0 %v3060_v39 }
 0x1e6   :  { %882 = vmatprep.subr.bf16.mxu0 %v3066_v41 }
 0x1e8   :  { %764 = vmatpush1.bf16.msra.mxu1 %v3156_v59 }
 0x1e9   :  { %765 = vmatprep.subr.bf16.mxu1 %v4181_v34  ;;  %883 = vmatpush1.bf16.msra.mxu0 %v3072_v43 }
 0x1ea   :  { %884 = vmatprep.subr.bf16.mxu0 %v3078_v45 }
 0x1ec   :  { %766 = vmatpush1.bf16.msra.mxu1 %v3162_v60 }
 0x1ed   :  { %903 = vmatprep.subr.bf16.mxu1 %v2952_v2  ;;  %885 = vmatpush1.bf16.msra.mxu0 %v3084_v47  ;;  %v4182_v2 = vld [vmem:[#allocation9_spill] sm:$0xff] }
 0x1ee   :  { %944 = vmatprep.subr.bf16.mxu0 %v4181_v34 }
 0x1ef   :  { %776 = vmatmul.mubr.bf16.vlgmr.msra.gmra.mrb[8].mxu1 %v656_v63 }
 0x1f0   :  { %904 = vmatpush1.bf16.msra.mxu1 %v2957_v4  ;;  %v4185_v4 = vld [vmem:[#allocation12_spill] sm:$0xff] }
 0x1f1   :  { %905 = vmatprep.subr.bf16.mxu1 %v2964_v6  ;;  %v4186_v6 = vld [vmem:[#allocation13_spill] sm:$0xff] }
 0x1f4   :  { %906 = vmatpush1.bf16.msra.mxu1 %v2969_v8  ;;  %v4187_v8 = vld [vmem:[#allocation14_spill] sm:$0xff] }
 0x1f5   :  { %907 = vmatprep.subr.bf16.mxu1 %v2974_v10  ;;  %v4188_v10 = vld [vmem:[#allocation15_spill] sm:$0xff] }
 0x1f8   :  { %908 = vmatpush1.bf16.msra.mxu1 %v2978_v12  ;;  %v4189_v12 = vld [vmem:[#allocation16_spill] sm:$0xff] }
 0x1f9   :  { %909 = vmatprep.subr.bf16.mxu1 %v2986_v14 }
 0x1fc   :  { %910 = vmatpush1.bf16.msra.mxu1 %v2992_v16 }
 0x1fd   :  { %911 = vmatprep.subr.bf16.mxu1 %v2998_v18 }
 0x200   :  { %912 = vmatpush1.bf16.msra.mxu1 %v4182_v2 }
 0x201   :  { %913 = vmatprep.subr.bf16.mxu1 %v4183_v28 }
 0x204   :  { %914 = vmatpush1.bf16.msra.mxu1 %v4184_v26 }
 0x205   :  { %915 = vmatprep.subr.bf16.mxu1 %v4185_v4 }
 0x208   :  { %916 = vmatpush1.bf16.msra.mxu1 %v4186_v6 }
 0x209   :  { %917 = vmatprep.subr.bf16.mxu1 %v4187_v8 }
 0x20c   :  { %918 = vmatpush1.bf16.msra.mxu1 %v4188_v10 }
 0x20d   :  { %919 = vmatprep.subr.bf16.mxu1 %v4189_v12 }
 0x210   :  { %920 = vmatpush1.bf16.msra.mxu1 %v4190_v32 }
 0x211   :  { %921 = vmatprep.subr.bf16.mxu1 %v4191_v30 }
 0x214   :  { %922 = vmatpush1.bf16.msra.mxu1 %v4192_v1 }
 0x215   :  { %923 = vmatprep.subr.bf16.mxu1 %v4193_v22 }
 0x218   :  { %924 = vmatpush1.bf16.msra.mxu1 %v4194_v42 }
 0x219   :  { %925 = vmatprep.subr.bf16.mxu1 %v4195_v24  ;;  %v2486_v24 = vld [vmem:[%s4078_s0 + $0xa] sm:$0xff] }
 0x21c   :  { %926 = vmatpush1.bf16.msra.mxu1 %v4196_v44 }
 0x21d   :  { %1063 = vmatprep.subr.bf16.mxu1 %v4197_v20 }
 0x292   :  { %v695_v46 = vpop.f32.mrb[4].mxu1  ;;  %v736_v61 = vpop.f32.mrb[8].mxu0 }
 0x293   :  { %v697_v62 = vpop.f32.mrb[5].mxu1  ;;  %v738_v0 = vpop.f32.mrb[9].mxu0  ;;  %v803_v1 = vrot.slane %v736_v61, %v3196_v36 }
 0x294   :  { %v789_v63 = vcombine.low %v695_v46, %v697_v62  ;;  %v699_v32 = vpop.f32.mrb[6].mxu1  ;;  %v740_v12 = vpop.f32.mrb[10].mxu0 }
 0x295   :  { %v700_v30 = vpop.f32.mrb[7].mxu1  ;;  %v741_v10 = vpop.f32.mrb[11].mxu0 }
 0x296   :  { %v796_v22 = vrot.slane %v789_v63, %v3196_v36  ;;  %v813_v10 = vadd.f32 %v738_v0, %v3207_v38 }
 0x298   :  { %v804_v44 = vcombine.low %v796_v22, %v803_v1 }
 0x29a   :  { %v806_v42 = vadd.f32 %v2486_v24, %v804_v44 }
 0x29c   :  { %v2488_v20 = vmul.f32 -1.442695, %v806_v42 }
 0x29e   :  { %2707 = vpow2.f32 %v2488_v20 }
 0x2a8   :  { %v2708_v8 = vpop.eup %2707 }
 0x2a9   :  { %v810_v6 = vadd.f32 1.0, %v2708_v8  ;;  %v2487_v8 = vld [vmem:[%s4078_s0 + $0x12] sm:$0x3] }
 0x2aa   :  { %v830_v42 = vrot.slane %v2487_v8, 6 }
 0x2ab   :  { %2709 = vrcp.f32 %v810_v6  ;;  %v829_v6 = vrot.slane %v2486_v24, 6 }
 0x2ad   :  { %v831_v44 = vsel %vm629_vm0, %v829_v6, %v830_v42 }
 0x2b5   :  { %v2710_v46 = vpop.eup %2709 }
 0x2b6   :  { %836 = vrot.lane.b32.xlu0 %v2710_v46, %s2862_s23 }
 0x2c2   :  { %v777_v12 = vpop.f32.mrb[8].mxu1 }
 0x2c3   :  { %v814_v32 = vadd.f32 %v777_v12, %v3209_v40  ;;  %v779_v30 = vpop.f32.mrb[9].mxu1 }
 0x2c4   :  { %v780_v61 = vpop.f32.mrb[10].mxu1 }
 0x2c5   :  { %v817_v62 = vcombine.low %v813_v10, %v814_v32  ;;  %v781_v63 = vpop.f32.mrb[11].mxu1 }
 0x2c7   :  { %v824_v1 = vrot.slane %v817_v62, %v3196_v36 }
 0x2c9   :  { %v826_v22 = vmul.f32 %v2710_v46, %v824_v1 }
 0x2cb   :  { %v833_v20 = vadd.f32 %v831_v44, %v826_v22 }
 0x2cd   :  { %2711 = vtanh.f32 %v833_v20 }
 0x2d7   :  { %v2712_v32 = vpop.eup %2711 }
 0x328   :  { %v837_v0 = vpop.permute.xlu0 %836 }
 0x329   :  { %v838_v38 = vrot.slane %v837_v0, 2  ;;  %v839_v12 = vrot.slane %v837_v0, 4 }
 0x32b   :  { %v840_v30 = vsel %vm456_vm1, %v838_v38, %v839_v12  ;;  %v4210_v12 = vld [vmem:[#allocation24_spill] sm:$0xff] }
 0x32c   :  { %v842_v10 = vsub.f32 1.0, %v840_v30  ;;  %v844_v46 = vmul.f32 %v840_v30, %v3219_v48 }
 0x32e   :  { %v843_v61 = vmul.f32 %v2712_v32, %v842_v10 }
 0x330   :  { %v3313_v62 = vadd.f32 %v844_v46, %v843_v61 }
 0x332   :  { %v853_v24 = vrot.slane %v3313_v62, %v3196_v36 }
 0x334   :  { %v854_v63 = vcombine.high %v853_v24, %v853_v24  ;;  %v857_v8 = vpack.c.bf16 %v853_v24, %v853_v24 }
 0x336   :  { %v858_v1 = vpack.c.bf16 %v854_v63, %v854_v63 }
 0x338   :  { %2489 = vmatprep.mubr.msk.bf16.mxu0 %vm456_vm1, %v858_v1  ;;  %2490 = vmatprep.mubr.msk.bf16.mxu1 %vm456_vm1, %v858_v1 }
 0x339   :  { %895 = vmatmul.mubr.bf16.vlgmr.msra.gmra.mrb[12].mxu0 %v857_v8  ;;  %936 = vmatmul.mubr.bf16.vlgmr.msra.gmra.mrb[12].mxu1 %v857_v8 }
 0x33a   :  { %945 = vmatpush1.bf16.msra.mxu0 %v3092_v49  ;;  %2491 = vmatprep.mubr.msk.bf16.mxu0 %vm456_vm1, %v858_v1 }
 0x33b   :  { %946 = vmatprep.subr.bf16.mxu0 %v4181_v34  ;;  %1064 = vmatpush1.bf16.msra.mxu1 %v2955_v3  ;;  %v3365_v3 = vld [vmem:[#allocation2 + $0xc] ss:$20 sps:$4 sm:$0xff]  }
 0x33c   :  { %1065 = vmatprep.subr.bf16.mxu1 %v2960_v5  ;;  %v3370_v5 = vld [vmem:[#allocation2 + $0x8] ss:$20 sps:$4 sm:$0xff]  }
 0x33e   :  { %947 = vmatpush1.bf16.msra.mxu0 %v3098_v50 }
 0x33f   :  { %948 = vmatprep.subr.bf16.mxu0 %v4181_v34  ;;  %1066 = vmatpush1.bf16.msra.mxu1 %v2966_v7  ;;  %v3373_v7 = vld [vmem:[#allocation2 + $0x34] ss:$20 sps:$4 sm:$0xff]  }
 0x340   :  { %1067 = vmatprep.subr.bf16.mxu1 %v2972_v9  ;;  %v3376_v9 = vld [vmem:[#allocation2 + $0x30] ss:$20 sps:$4 sm:$0xff]  }
 0x342   :  { %949 = vmatpush1.bf16.msra.mxu0 %v3106_v51 }
 0x343   :  { %950 = vmatprep.subr.bf16.mxu0 %v4181_v34  ;;  %1068 = vmatpush1.bf16.msra.mxu1 %v2976_v11  ;;  %v3379_v11 = vld [vmem:[#allocation2 + $0x5c] ss:$20 sps:$4 sm:$0xff]  }
 0x344   :  { %1069 = vmatprep.subr.bf16.mxu1 %v2982_v13  ;;  %v3382_v13 = vld [vmem:[#allocation2 + $0x58] ss:$20 sps:$4 sm:$0xff]  }
 0x346   :  { %951 = vmatpush1.bf16.msra.mxu0 %v3114_v52 }
 0x347   :  { %952 = vmatprep.subr.bf16.mxu0 %v4181_v34  ;;  %1070 = vmatpush1.bf16.msra.mxu1 %v2988_v15  ;;  %v4198_v15 = vld [vmem:[#allocation13_spill] sm:$0xff] }
 0x348   :  { %1071 = vmatprep.subr.bf16.mxu1 %v2994_v17  ;;  %v4199_v17 = vld [vmem:[#allocation14_spill] sm:$0xff] }
 0x34a   :  { %953 = vmatpush1.bf16.msra.mxu0 %v3120_v53 }
 0x34b   :  { %954 = vmatprep.subr.bf16.mxu0 %v4181_v34  ;;  %1072 = vmatpush1.bf16.msra.mxu1 %v3000_v19  ;;  %v4200_v19 = vld [vmem:[#allocation15_spill] sm:$0xff] }
 0x34c   :  { %1073 = vmatprep.subr.bf16.mxu1 %v3006_v21  ;;  %v4201_v21 = vld [vmem:[#allocation16_spill] sm:$0xff] }
 0x34e   :  { %955 = vmatpush1.bf16.msra.mxu0 %v3126_v54 }
 0x34f   :  { %956 = vmatprep.subr.bf16.mxu0 %v4181_v34  ;;  %1074 = vmatpush1.bf16.msra.mxu1 %v3012_v23  ;;  %v4205_v23 = vld [vmem:[#allocation20_spill] sm:$0xff] }
 0x350   :  { %1075 = vmatprep.subr.bf16.mxu1 %v3018_v25  ;;  %v4206_v25 = vld [vmem:[#allocation21_spill] sm:$0xff] }
 0x352   :  { %957 = vmatpush1.bf16.msra.mxu0 %v3132_v55 }
 0x353   :  { %958 = vmatprep.subr.bf16.mxu0 %v4181_v34  ;;  %1076 = vmatpush1.bf16.msra.mxu1 %v3024_v27  ;;  %v4207_v27 = vld [vmem:[#allocation22_spill] sm:$0xff] }
 0x354   :  { %1077 = vmatprep.subr.bf16.mxu1 %v3030_v29  ;;  %v4208_v29 = vld [vmem:[#allocation23_spill] sm:$0xff] }
 0x356   :  { %959 = vmatpush1.bf16.msra.mxu0 %v3138_v56 }
 0x357   :  { %960 = vmatprep.subr.bf16.mxu0 %v4181_v34  ;;  %1078 = vmatpush1.bf16.msra.mxu1 %v3036_v31  ;;  %v3403_v31 = vld [vmem:[#allocation2 + $0x4] ss:$20 sps:$4 sm:$0xff]  }
 0x358   :  { %1079 = vmatprep.subr.bf16.mxu1 %v3042_v33  ;;  %4209 = vst [vmem:[#allocation9_spill] sm:$0xff] %v3403_v31 }
 0x35a   :  { %961 = vmatpush1.bf16.msra.mxu0 %v3144_v57 }
 0x35b   :  { %962 = vmatprep.subr.bf16.mxu0 %v4181_v34  ;;  %1080 = vmatpush1.bf16.msra.mxu1 %v3048_v35 }
 0x35c   :  { %1081 = vmatprep.subr.bf16.mxu1 %v3054_v37 }
 0x35e   :  { %963 = vmatpush1.bf16.msra.mxu0 %v3150_v58 }
 0x35f   :  { %964 = vmatprep.subr.bf16.mxu0 %v4181_v34  ;;  %1082 = vmatpush1.bf16.msra.mxu1 %v3060_v39 }
 0x360   :  { %1083 = vmatprep.subr.bf16.mxu1 %v3066_v41 }
 0x362   :  { %965 = vmatpush1.bf16.msra.mxu0 %v3156_v59 }
 0x363   :  { %966 = vmatprep.subr.bf16.mxu0 %v4181_v34  ;;  %1084 = vmatpush1.bf16.msra.mxu1 %v3072_v43 }
 0x364   :  { %1085 = vmatprep.subr.bf16.mxu1 %v3078_v45 }
 0x366   :  { %967 = vmatpush1.bf16.msra.mxu0 %v3162_v60 }
 0x367   :  { %1104 = vmatprep.subr.bf16.mxu0 %v3365_v3  ;;  %1086 = vmatpush1.bf16.msra.mxu1 %v3084_v47 }
 0x368   :  { %1145 = vmatprep.subr.bf16.mxu1 %v4181_v34 }
 0x369   :  { %977 = vmatmul.mubr.bf16.vlgmr.msra.gmra.mrb[16].mxu0 %v857_v8  ;;  %v2493_v8 = vld [vmem:[%s4078_s0 + $0x1c] sm:$0x3] }
 0x36a   :  { %1105 = vmatpush1.bf16.msra.mxu0 %v3370_v5 }
 0x36b   :  { %1106 = vmatprep.subr.bf16.mxu0 %v3373_v7 }
 0x36e   :  { %1107 = vmatpush1.bf16.msra.mxu0 %v3376_v9 }
 0x36f   :  { %1108 = vmatprep.subr.bf16.mxu0 %v3379_v11 }
 0x372   :  { %1109 = vmatpush1.bf16.msra.mxu0 %v3382_v13 }
 0x373   :  { %1110 = vmatprep.subr.bf16.mxu0 %v2986_v14  ;;  %v4202_v14 = vld [vmem:[#allocation17_spill] sm:$0xff] }
 0x376   :  { %1111 = vmatpush1.bf16.msra.mxu0 %v2992_v16  ;;  %v4203_v16 = vld [vmem:[#allocation18_spill] sm:$0xff] }
 0x377   :  { %1112 = vmatprep.subr.bf16.mxu0 %v2998_v18  ;;  %v4204_v18 = vld [vmem:[#allocation19_spill] sm:$0xff] }
 0x37a   :  { %1113 = vmatpush1.bf16.msra.mxu0 %v4182_v2 }
 0x37b   :  { %1114 = vmatprep.subr.bf16.mxu0 %v4183_v28 }
 0x37e   :  { %1115 = vmatpush1.bf16.msra.mxu0 %v4184_v26  ;;  %v2492_v26 = vld [vmem:[%s4078_s0 + $0x14] sm:$0xff] }
 0x37f   :  { %1116 = vmatprep.subr.bf16.mxu0 %v4185_v4 }
 0x382   :  { %1117 = vmatpush1.bf16.msra.mxu0 %v4198_v15  ;;  %v1030_v15 = vrot.slane %v2492_v26, 6 }
 0x383   :  { %1118 = vmatprep.subr.bf16.mxu0 %v4199_v17  ;;  %v1031_v17 = vrot.slane %v2493_v8, 6  ;;  %v3569_v8 = vld [vmem:[#allocation2 + $0x170] ss:$20 sps:$4 sm:$0xff]  }
 0x384   :  { %4223 = vst [vmem:[#allocation21_spill] sm:$0xff] %v3569_v8 }
 0x386   :  { %1119 = vmatpush1.bf16.msra.mxu0 %v4200_v19  ;;  %v1032_v19 = vsel %vm629_vm0, %v1030_v15, %v1031_v17  ;;  %v3572_v15 = vld [vmem:[#allocation2 + $0x19c] ss:$20 sps:$4 sm:$0xff]   ;;  %v3575_v17 = vld [vmem:[#allocation2 + $0x198] ss:$20 sps:$4 sm:$0xff]  }
 0x387   :  { %1120 = vmatprep.subr.bf16.mxu0 %v4201_v21  ;;  %4224 = vst [vmem:[#allocation22_spill] sm:$0xff] %v3572_v15  ;;  %4225 = vst [vmem:[#allocation23_spill] sm:$0xff] %v3575_v17 }
 0x38a   :  { %1121 = vmatpush1.bf16.msra.mxu0 %v4202_v14 }
 0x38b   :  { %1122 = vmatprep.subr.bf16.mxu0 %v4203_v16 }
 0x38e   :  { %1123 = vmatpush1.bf16.msra.mxu0 %v4204_v18 }
 0x38f   :  { %1124 = vmatprep.subr.bf16.mxu0 %v4205_v23 }
 0x392   :  { %1125 = vmatpush1.bf16.msra.mxu0 %v4206_v25 }
 0x393   :  { %1126 = vmatprep.subr.bf16.mxu0 %v4207_v27 }
 0x396   :  { %1127 = vmatpush1.bf16.msra.mxu0 %v4208_v29 }
 0x397   :  { %1264 = vmatprep.subr.bf16.mxu0 %v3403_v31 }
 0x40c   :  { %v896_v33 = vpop.f32.mrb[12].mxu0  ;;  %v937_v35 = vpop.f32.mrb[12].mxu1 }
 0x40d   :  { %v898_v37 = vpop.f32.mrb[13].mxu0  ;;  %v939_v39 = vpop.f32.mrb[13].mxu1  ;;  %v1004_v2 = vrot.slane %v937_v35, %v3196_v36 }
 0x40e   :  { %v990_v41 = vcombine.low %v896_v33, %v898_v37  ;;  %v900_v43 = vpop.f32.mrb[14].mxu0  ;;  %v941_v45 = vpop.f32.mrb[14].mxu1  ;;  %v1014_v30 = vadd.f32 %v939_v39, %v4210_v12 }
 0x40f   :  { %v901_v38 = vpop.f32.mrb[15].mxu0  ;;  %v942_v48 = vpop.f32.mrb[15].mxu1  ;;  %v3437_v45 = vld [vmem:[#allocation2 + $0x2c] ss:$20 sps:$4 sm:$0xff]  }
 0x410   :  { %v997_v28 = vrot.slane %v990_v41, %v3196_v36  ;;  %v3442_v38 = vld [vmem:[#allocation2 + $0x28] ss:$20 sps:$4 sm:$0xff]   ;;  %v3450_v48 = vld [vmem:[#allocation2 + $0x50] ss:$20 sps:$4 sm:$0xff]  }
 0x412   :  { %v1005_v4 = vcombine.low %v997_v28, %v1004_v2  ;;  %v3453_v2 = vld [vmem:[#allocation2 + $0x7c] ss:$20 sps:$4 sm:$0xff]   ;;  %v3461_v28 = vld [vmem:[#allocation2 + $0xa4] ss:$20 sps:$4 sm:$0xff]  }
 0x414   :  { %v1007_v22 = vadd.f32 %v2492_v26, %v1005_v4  ;;  %v3469_v26 = vld [vmem:[#allocation2 + $0xcc] ss:$20 sps:$4 sm:$0xff]   ;;  %v3477_v4 = vld [vmem:[#allocation2 + $0xf4] ss:$20 sps:$4 sm:$0xff]  }
 0x416   :  { %v2494_v6 = vmul.f32 -1.442695, %v1007_v22  ;;  %v3485_v22 = vld [vmem:[#allocation2 + $0x11c] ss:$20 sps:$4 sm:$0xff]  }
 0x418   :  { %2713 = vpow2.f32 %v2494_v6  ;;  %v3493_v6 = vld [vmem:[#allocation2 + $0x144] ss:$20 sps:$4 sm:$0xff]  }
 0x422   :  { %v2714_v42 = vpop.eup %2713 }
 0x423   :  { %v1011_v44 = vadd.f32 1.0, %v2714_v42  ;;  %v3501_v42 = vld [vmem:[#allocation2 + $0x16c] ss:$20 sps:$4 sm:$0xff]  }
 0x425   :  { %2715 = vrcp.f32 %v1011_v44  ;;  %v3509_v44 = vld [vmem:[#allocation2 + $0x194] ss:$20 sps:$4 sm:$0xff]  }
 0x42f   :  { %v2716_v20 = vpop.eup %2715 }
 0x430   :  { %1037 = vrot.lane.b32.xlu1 %v2716_v20, %s2862_s23 }
 0x43c   :  { %v978_v0 = vpop.f32.mrb[16].mxu0 }
 0x43d   :  { %v1015_v10 = vadd.f32 %v978_v0, %v3209_v40  ;;  %v980_v32 = vpop.f32.mrb[17].mxu0  ;;  %v3542_v0 = vld [vmem:[#allocation2 + $0xd4] ss:$20 sps:$4 sm:$0xff]  }
 0x43e   :  { %v981_v61 = vpop.f32.mrb[18].mxu0  ;;  %4214 = vst [vmem:[#allocation8_spill] sm:$0xff] %v3542_v0  ;;  %v3551_v32 = vld [vmem:[#allocation2 + $0xf8] ss:$20 sps:$4 sm:$0xff]  }
 0x43f   :  { %v1018_v46 = vcombine.low %v1014_v30, %v1015_v10  ;;  %v982_v24 = vpop.f32.mrb[19].mxu0  ;;  %v3545_v30 = vld [vmem:[#allocation2 + $0xd0] ss:$20 sps:$4 sm:$0xff]   ;;  %4217 = vst [vmem:[#allocation15_spill] sm:$0xff] %v3551_v32 }
 0x440   :  { %4215 = vst [vmem:[#allocation13_spill] sm:$0xff] %v3545_v30  ;;  %v3548_v10 = vld [vmem:[#allocation2 + $0xfc] ss:$20 sps:$4 sm:$0xff]   ;;  %v3554_v61 = vld [vmem:[#allocation2 + $0x124] ss:$20 sps:$4 sm:$0xff]  }
 0x441   :  { %v1025_v63 = vrot.slane %v1018_v46, %v3196_v36  ;;  %4216 = vst [vmem:[#allocation14_spill] sm:$0xff] %v3548_v10  ;;  %4218 = vst [vmem:[#allocation16_spill] sm:$0xff] %v3554_v61  ;;  %v3557_v46 = vld [vmem:[#allocation2 + $0x120] ss:$20 sps:$4 sm:$0xff]  }
 0x442   :  { %4219 = vst [vmem:[#allocation17_spill] sm:$0xff] %v3557_v46  ;;  %v3560_v24 = vld [vmem:[#allocation2 + $0x14c] ss:$20 sps:$4 sm:$0xff]  }
 0x443   :  { %v1027_v1 = vmul.f32 %v2716_v20, %v1025_v63  ;;  %v3517_v20 = vld [vmem:[#allocation2 + $0x1bc] ss:$20 sps:$4 sm:$0xff]   ;;  %4220 = vst [vmem:[#allocation18_spill] sm:$0xff] %v3560_v24 }
 0x444   :  { %v3563_v63 = vld [vmem:[#allocation2 + $0x148] ss:$20 sps:$4 sm:$0xff]  }
 0x445   :  { %v1034_v21 = vadd.f32 %v1032_v19, %v1027_v1  ;;  %4221 = vst [vmem:[#allocation19_spill] sm:$0xff] %v3563_v63  ;;  %v3566_v1 = vld [vmem:[#allocation2 + $0x174] ss:$20 sps:$4 sm:$0xff]   ;;  %v3578_v19 = vld [vmem:[#allocation2 + $0x1c4] ss:$20 sps:$4 sm:$0xff]  }
 0x446   :  { %4222 = vst [vmem:[#allocation20_spill] sm:$0xff] %v3566_v1  ;;  %4226 = vst [vmem:[#allocation25_spill] sm:$0xff] %v3578_v19 }
 0x447   :  { %2717 = vtanh.f32 %v1034_v21  ;;  %v3581_v21 = vld [vmem:[#allocation2 + $0x1c0] ss:$20 sps:$4 sm:$0xff]  }
 0x448   :  { %4227 = vst [vmem:[#allocation26_spill] sm:$0xff] %v3581_v21 }
 0x451   :  { %v2718_v27 = vpop.eup %2717 }
 0x4a2   :  { %v1038_v14 = vpop.permute.xlu1 %1037 }
 0x4a3   :  { %v1039_v16 = vrot.slane %v1038_v14, 2  ;;  %v1040_v18 = vrot.slane %v1038_v14, 4 }
 0x4a5   :  { %v1041_v23 = vsel %vm456_vm1, %v1039_v16, %v1040_v18 }
 0x4a6   :  { %v1043_v25 = vsub.f32 1.0, %v1041_v23  ;;  %v1045_v33 = vmul.f32 %v1041_v23, %v3313_v62  ;;  %v3434_v62 = vld [vmem:[#allocation2] ss:$20 sps:$4 sm:$0xff]  }
 0x4a8   :  { %v1044_v29 = vmul.f32 %v2718_v27, %v1043_v25 }
 0x4aa   :  { %v3421_v35 = vadd.f32 %v1045_v33, %v1044_v29 }
 0x4ac   :  { %v1054_v37 = vrot.slane %v3421_v35, %v3196_v36 }
 0x4ae   :  { %v1055_v39 = vcombine.high %v1054_v37, %v1054_v37  ;;  %v3425_v43 = vpack.c.bf16 %v1054_v37, %v1054_v37 }
 0x4b0   :  { %v1059_v41 = vpack.c.bf16 %v1055_v39, %v1055_v39 }
 0x4b2   :  { %2495 = vmatprep.mubr.msk.bf16.mxu1 %vm456_vm1, %v1059_v41  ;;  %2496 = vmatprep.mubr.msk.bf16.mxu0 %vm456_vm1, %v1059_v41 }
 0x4b3   :  { %1096 = vmatmul.mubr.bf16.vlgmr.msra.gmra.mrb[16].mxu1 %v3425_v43  ;;  %1137 = vmatmul.mubr.bf16.vlgmr.msra.gmra.mrb[20].mxu0 %v3425_v43 }
 0x4b4   :  { %1146 = vmatpush1.bf16.msra.mxu1 %v3092_v49  ;;  %2497 = vmatprep.mubr.msk.bf16.mxu1 %vm456_vm1, %v1059_v41  ;;  %v3445_v49 = vld [vmem:[#allocation2 + $0x54] ss:$20 sps:$4 sm:$0xff]  }
 0x4b5   :  { %1147 = vmatprep.subr.bf16.mxu1 %v4181_v34  ;;  %1265 = vmatpush1.bf16.msra.mxu0 %v3434_v62 }
 0x4b6   :  { %1266 = vmatprep.subr.bf16.mxu0 %v3437_v45 }
 0x4b8   :  { %1148 = vmatpush1.bf16.msra.mxu1 %v3098_v50  ;;  %v3458_v50 = vld [vmem:[#allocation2 + $0x78] ss:$20 sps:$4 sm:$0xff]  }
 0x4b9   :  { %1149 = vmatprep.subr.bf16.mxu1 %v4181_v34  ;;  %1267 = vmatpush1.bf16.msra.mxu0 %v3442_v38 }
 0x4ba   :  { %1268 = vmatprep.subr.bf16.mxu0 %v3445_v49 }
 0x4bc   :  { %1150 = vmatpush1.bf16.msra.mxu1 %v3106_v51  ;;  %v3466_v51 = vld [vmem:[#allocation2 + $0xa0] ss:$20 sps:$4 sm:$0xff]  }
 0x4bd   :  { %1151 = vmatprep.subr.bf16.mxu1 %v4181_v34  ;;  %1269 = vmatpush1.bf16.msra.mxu0 %v3450_v48 }
 0x4be   :  { %1270 = vmatprep.subr.bf16.mxu0 %v3453_v2 }
 0x4c0   :  { %1152 = vmatpush1.bf16.msra.mxu1 %v3114_v52  ;;  %v3474_v52 = vld [vmem:[#allocation2 + $0xc8] ss:$20 sps:$4 sm:$0xff]  }
 0x4c1   :  { %1153 = vmatprep.subr.bf16.mxu1 %v4181_v34  ;;  %1271 = vmatpush1.bf16.msra.mxu0 %v3458_v50 }
 0x4c2   :  { %1272 = vmatprep.subr.bf16.mxu0 %v3461_v28 }
 0x4c4   :  { %1154 = vmatpush1.bf16.msra.mxu1 %v3120_v53  ;;  %v3482_v53 = vld [vmem:[#allocation2 + $0xf0] ss:$20 sps:$4 sm:$0xff]  }
 0x4c5   :  { %1155 = vmatprep.subr.bf16.mxu1 %v4181_v34  ;;  %1273 = vmatpush1.bf16.msra.mxu0 %v3466_v51 }
 0x4c6   :  { %1274 = vmatprep.subr.bf16.mxu0 %v3469_v26 }
 0x4c8   :  { %1156 = vmatpush1.bf16.msra.mxu1 %v3126_v54  ;;  %v3490_v54 = vld [vmem:[#allocation2 + $0x118] ss:$20 sps:$4 sm:$0xff]  }
 0x4c9   :  { %1157 = vmatprep.subr.bf16.mxu1 %v4181_v34  ;;  %1275 = vmatpush1.bf16.msra.mxu0 %v3474_v52 }
 0x4ca   :  { %1276 = vmatprep.subr.bf16.mxu0 %v3477_v4 }
 0x4cc   :  { %1158 = vmatpush1.bf16.msra.mxu1 %v3132_v55  ;;  %v3498_v55 = vld [vmem:[#allocation2 + $0x140] ss:$20 sps:$4 sm:$0xff]  }
 0x4cd   :  { %1159 = vmatprep.subr.bf16.mxu1 %v4181_v34  ;;  %1277 = vmatpush1.bf16.msra.mxu0 %v3482_v53 }
 0x4ce   :  { %1278 = vmatprep.subr.bf16.mxu0 %v3485_v22 }
 0x4d0   :  { %1160 = vmatpush1.bf16.msra.mxu1 %v3138_v56  ;;  %v3506_v56 = vld [vmem:[#allocation2 + $0x168] ss:$20 sps:$4 sm:$0xff]  }
 0x4d1   :  { %1161 = vmatprep.subr.bf16.mxu1 %v4181_v34  ;;  %1279 = vmatpush1.bf16.msra.mxu0 %v3490_v54 }
 0x4d2   :  { %1280 = vmatprep.subr.bf16.mxu0 %v3493_v6 }
 0x4d4   :  { %1162 = vmatpush1.bf16.msra.mxu1 %v3144_v57  ;;  %v3514_v57 = vld [vmem:[#allocation2 + $0x190] ss:$20 sps:$4 sm:$0xff]  }
 0x4d5   :  { %1163 = vmatprep.subr.bf16.mxu1 %v4181_v34  ;;  %1281 = vmatpush1.bf16.msra.mxu0 %v3498_v55 }
 0x4d6   :  { %1282 = vmatprep.subr.bf16.mxu0 %v3501_v42 }
 0x4d8   :  { %1164 = vmatpush1.bf16.msra.mxu1 %v3150_v58  ;;  %v3530_v58 = vld [vmem:[#allocation2 + $0x84] ss:$20 sps:$4 sm:$0xff]  }
 0x4d9   :  { %1165 = vmatprep.subr.bf16.mxu1 %v4181_v34  ;;  %1283 = vmatpush1.bf16.msra.mxu0 %v3506_v56 }
 0x4da   :  { %1284 = vmatprep.subr.bf16.mxu0 %v3509_v44 }
 0x4dc   :  { %1166 = vmatpush1.bf16.msra.mxu1 %v3156_v59  ;;  %v3533_v59 = vld [vmem:[#allocation2 + $0x80] ss:$20 sps:$4 sm:$0xff]  }
 0x4dd   :  { %1167 = vmatprep.subr.bf16.mxu1 %v4181_v34  ;;  %1285 = vmatpush1.bf16.msra.mxu0 %v3514_v57  ;;  %4211 = vst [vmem:[#allocation10_spill] sm:$0xff] %v3533_v59 }
 0x4de   :  { %1286 = vmatprep.subr.bf16.mxu0 %v3517_v20 }
 0x4e0   :  { %1168 = vmatpush1.bf16.msra.mxu1 %v3162_v60  ;;  %v3539_v60 = vld [vmem:[#allocation2 + $0xa8] ss:$20 sps:$4 sm:$0xff]  }
 0x4e1   :  { %1305 = vmatprep.subr.bf16.mxu1 %v3365_v3  ;;  %1287 = vmatpush1.bf16.msra.mxu0 %v3084_v47  ;;  %v3536_v47 = vld [vmem:[#allocation2 + $0xac] ss:$20 sps:$4 sm:$0xff]   ;;  %4213 = vst [vmem:[#allocation12_spill] sm:$0xff] %v3539_v60 }
 0x4e2   :  { %1346 = vmatprep.subr.bf16.mxu0 %v4181_v34  ;;  %4212 = vst [vmem:[#allocation11_spill] sm:$0xff] %v3536_v47 }
 0x4e3   :  { %1178 = vmatmul.mubr.bf16.vlgmr.msra.gmra.mrb[20].mxu1 %v3425_v43  ;;  %v2498_v43 = vld [vmem:[%s4078_s0 + $0x1e] sm:$0xff] }
 0x4e4   :  { %1306 = vmatpush1.bf16.msra.mxu1 %v3370_v5 }
 0x4e5   :  { %1307 = vmatprep.subr.bf16.mxu1 %v3373_v7 }
 0x4e8   :  { %1308 = vmatpush1.bf16.msra.mxu1 %v3376_v9 }
 0x4e9   :  { %1309 = vmatprep.subr.bf16.mxu1 %v3379_v11 }
 0x4ec   :  { %1310 = vmatpush1.bf16.msra.mxu1 %v3382_v13 }
 0x4ed   :  { %1311 = vmatprep.subr.bf16.mxu1 %v3530_v58 }
 0x4f0   :  { %1312 = vmatpush1.bf16.msra.mxu1 %v3533_v59 }
 0x4f1   :  { %1313 = vmatprep.subr.bf16.mxu1 %v3536_v47 }
 0x4f4   :  { %1314 = vmatpush1.bf16.msra.mxu1 %v3539_v60 }
 0x4f5   :  { %1315 = vmatprep.subr.bf16.mxu1 %v3542_v0 }
 0x4f8   :  { %1316 = vmatpush1.bf16.msra.mxu1 %v3545_v30 }
 0x4f9   :  { %1317 = vmatprep.subr.bf16.mxu1 %v3548_v10 }
 0x4fc   :  { %1318 = vmatpush1.bf16.msra.mxu1 %v3551_v32 }
 0x4fd   :  { %1319 = vmatprep.subr.bf16.mxu1 %v3554_v61 }
 0x500   :  { %1320 = vmatpush1.bf16.msra.mxu1 %v3557_v46 }
 0x501   :  { %1321 = vmatprep.subr.bf16.mxu1 %v3560_v24 }
 0x504   :  { %1322 = vmatpush1.bf16.msra.mxu1 %v3563_v63 }
 0x505   :  { %1323 = vmatprep.subr.bf16.mxu1 %v3566_v1 }
 0x508   :  { %1324 = vmatpush1.bf16.msra.mxu1 %v3569_v8 }
 0x509   :  { %1325 = vmatprep.subr.bf16.mxu1 %v3572_v15 }
 0x50c   :  { %1326 = vmatpush1.bf16.msra.mxu1 %v3575_v17 }
 0x50d   :  { %1327 = vmatprep.subr.bf16.mxu1 %v3578_v19 }
 0x510   :  { %1328 = vmatpush1.bf16.msra.mxu1 %v3581_v21 }
 0x511   :  { %1465 = vmatprep.subr.bf16.mxu1 %v3403_v31 }
 0x586   :  { %v1097_v14 = vpop.f32.mrb[16].mxu1  ;;  %v1138_v16 = vpop.f32.mrb[20].mxu0 }
 0x587   :  { %v1099_v18 = vpop.f32.mrb[17].mxu1  ;;  %v1140_v23 = vpop.f32.mrb[21].mxu0  ;;  %v1205_v39 = vrot.slane %v1138_v16, %v3196_v36 }
 0x588   :  { %v1191_v25 = vcombine.low %v1097_v14, %v1099_v18  ;;  %v1101_v27 = vpop.f32.mrb[18].mxu1  ;;  %v1142_v29 = vpop.f32.mrb[22].mxu0 }
 0x589   :  { %v1102_v33 = vpop.f32.mrb[19].mxu1  ;;  %v1143_v37 = vpop.f32.mrb[23].mxu0  ;;  %v1215_v27 = vadd.f32 %v1140_v23, %v4210_v12 }
 0x58a   :  { %v1198_v41 = vrot.slane %v1191_v25, %v3196_v36 }
 0x58c   :  { %v1206_v21 = vcombine.low %v1198_v41, %v1205_v39 }
 0x58e   :  { %v1208_v19 = vadd.f32 %v2498_v43, %v1206_v21 }
 0x590   :  { %v2500_v31 = vmul.f32 -1.442695, %v1208_v19 }
 0x592   :  { %2719 = vpow2.f32 %v2500_v31  ;;  %v2499_v31 = vld [vmem:[%s4078_s0 + $0x26] sm:$0x3] }
 0x59c   :  { %v2720_v17 = vpop.eup %2719 }
 0x59d   :  { %v1212_v15 = vadd.f32 1.0, %v2720_v17  ;;  %v1232_v17 = vrot.slane %v2499_v31, 6 }
 0x59f   :  { %2721 = vrcp.f32 %v1212_v15  ;;  %v1231_v15 = vrot.slane %v2498_v43, 6 }
 0x5a1   :  { %v1233_v19 = vsel %vm629_vm0, %v1231_v15, %v1232_v17  ;;  %v3629_v15 = vld [vmem:[#allocation2 + $0x88] ss:$20 sps:$4 sm:$0xff]   ;;  %v3635_v17 = vld [vmem:[#allocation2 + $0xb0] ss:$20 sps:$4 sm:$0xff]  }
 0x5a9   :  { %v2722_v14 = vpop.eup %2721 }
 0x5aa   :  { %1238 = vrot.lane.b32.xlu1 %v2722_v14, %s2862_s23 }
 0x5b6   :  { %v1179_v18 = vpop.f32.mrb[20].mxu1 }
 0x5b7   :  { %v1216_v16 = vadd.f32 %v1179_v18, %v3209_v40  ;;  %v1181_v25 = vpop.f32.mrb[21].mxu1 }
 0x5b8   :  { %v1182_v29 = vpop.f32.mrb[22].mxu1 }
 0x5b9   :  { %v1219_v33 = vcombine.low %v1215_v27, %v1216_v16  ;;  %v1183_v37 = vpop.f32.mrb[23].mxu1 }
 0x5bb   :  { %v1226_v39 = vrot.slane %v1219_v33, %v3196_v36 }
 0x5bd   :  { %v1228_v21 = vmul.f32 %v2722_v14, %v1226_v39 }
 0x5bf   :  { %v1235_v41 = vadd.f32 %v1233_v19, %v1228_v21  ;;  %v3623_v21 = vld [vmem:[#allocation2 + $0x60] ss:$20 sps:$4 sm:$0xff]   ;;  %v3641_v19 = vld [vmem:[#allocation2 + $0xd8] ss:$20 sps:$4 sm:$0xff]  }
 0x5c1   :  { %2723 = vtanh.f32 %v1235_v41  ;;  %v3647_v41 = vld [vmem:[#allocation2 + $0x100] ss:$20 sps:$4 sm:$0xff]  }
 0x5cb   :  { %v2724_v16 = vpop.eup %2723 }
 0x61c   :  { %v1239_v23 = vpop.permute.xlu1 %1238 }
 0x61d   :  { %v1240_v12 = vrot.slane %v1239_v23, 2  ;;  %v1241_v18 = vrot.slane %v1239_v23, 4  ;;  %v3653_v23 = vld [vmem:[#allocation2 + $0x128] ss:$20 sps:$4 sm:$0xff]  }
 0x61f   :  { %v1242_v25 = vsel %vm456_vm1, %v1240_v12, %v1241_v18  ;;  %v3610_v12 = vld [vmem:[#allocation2 + $0x10] ss:$20 sps:$4 sm:$0xff]  }
 0x620   :  { %v1244_v27 = vsub.f32 1.0, %v1242_v25  ;;  %v1246_v14 = vmul.f32 %v1242_v25, %v3421_v35  ;;  %v3617_v35 = vld [vmem:[#allocation2 + $0x38] ss:$20 sps:$4 sm:$0xff]   ;;  %v3659_v18 = vld [vmem:[#allocation2 + $0x150] ss:$20 sps:$4 sm:$0xff]  }
 0x621   :  { %v3665_v25 = vld [vmem:[#allocation2 + $0x178] ss:$20 sps:$4 sm:$0xff]  }
 0x622   :  { %v1245_v29 = vmul.f32 %v2724_v16, %v1244_v27  ;;  %v3671_v27 = vld [vmem:[#allocation2 + $0x1a0] ss:$20 sps:$4 sm:$0xff]   ;;  %v3677_v16 = vld [vmem:[#allocation2 + $0x1c8] ss:$20 sps:$4 sm:$0xff]  }
 0x624   :  { %v3600_v33 = vadd.f32 %v1246_v14, %v1245_v29  ;;  %v3681_v29 = vld [vmem:[#allocation2 + $0x1b8] ss:$20 sps:$4 sm:$0xff]  }
 0x625   :  { %v4228_v14 = vld [vmem:[#allocation22_spill] sm:$0xff] }
 0x626   :  { %v1255_v43 = vrot.slane %v3600_v33, %v3196_v36 }
 0x628   :  { %v1256_v37 = vcombine.high %v1255_v43, %v1255_v43  ;;  %v3604_v31 = vpack.c.bf16 %v1255_v43, %v1255_v43  ;;  %v4229_v43 = vld [vmem:[#allocation23_spill] sm:$0xff] }
 0x62a   :  { %v1260_v39 = vpack.c.bf16 %v1256_v37, %v1256_v37  ;;  %v4230_v37 = vld [vmem:[#allocation25_spill] sm:$0xff] }
 0x62c   :  { %2501 = vmatprep.mubr.msk.bf16.mxu0 %vm456_vm1, %v1260_v39  ;;  %2502 = vmatprep.mubr.msk.bf16.mxu1 %vm456_vm1, %v1260_v39 }
 0x62d   :  { %1297 = vmatmul.mubr.bf16.vlgmr.msra.gmra.mrb[24].mxu0 %v3604_v31  ;;  %1338 = vmatmul.mubr.bf16.vlgmr.msra.gmra.mrb[24].mxu1 %v3604_v31 }
 0x62e   :  { %1347 = vmatpush1.bf16.msra.mxu0 %v3610_v12  ;;  %2503 = vmatprep.mubr.msk.bf16.mxu0 %vm456_vm1, %v1260_v39  ;;  %v4231_v39 = vld [vmem:[#allocation26_spill] sm:$0xff] }
 0x62f   :  { %1348 = vmatprep.subr.bf16.mxu0 %v4181_v34  ;;  %1466 = vmatpush1.bf16.msra.mxu1 %v3434_v62 }
 0x630   :  { %1467 = vmatprep.subr.bf16.mxu1 %v3437_v45 }
 0x632   :  { %1349 = vmatpush1.bf16.msra.mxu0 %v3617_v35 }
 0x633   :  { %1350 = vmatprep.subr.bf16.mxu0 %v4181_v34  ;;  %1468 = vmatpush1.bf16.msra.mxu1 %v3442_v38 }
 0x634   :  { %1469 = vmatprep.subr.bf16.mxu1 %v3445_v49 }
 0x636   :  { %1351 = vmatpush1.bf16.msra.mxu0 %v3623_v21 }
 0x637   :  { %1352 = vmatprep.subr.bf16.mxu0 %v4181_v34  ;;  %1470 = vmatpush1.bf16.msra.mxu1 %v3450_v48 }
 0x638   :  { %1471 = vmatprep.subr.bf16.mxu1 %v3453_v2 }
 0x63a   :  { %1353 = vmatpush1.bf16.msra.mxu0 %v3629_v15 }
 0x63b   :  { %1354 = vmatprep.subr.bf16.mxu0 %v4181_v34  ;;  %1472 = vmatpush1.bf16.msra.mxu1 %v3458_v50 }
 0x63c   :  { %1473 = vmatprep.subr.bf16.mxu1 %v3461_v28 }
 0x63e   :  { %1355 = vmatpush1.bf16.msra.mxu0 %v3635_v17 }
 0x63f   :  { %1356 = vmatprep.subr.bf16.mxu0 %v4181_v34  ;;  %1474 = vmatpush1.bf16.msra.mxu1 %v3466_v51 }
 0x640   :  { %1475 = vmatprep.subr.bf16.mxu1 %v3469_v26 }
 0x642   :  { %1357 = vmatpush1.bf16.msra.mxu0 %v3641_v19 }
 0x643   :  { %1358 = vmatprep.subr.bf16.mxu0 %v4181_v34  ;;  %1476 = vmatpush1.bf16.msra.mxu1 %v3474_v52 }
 0x644   :  { %1477 = vmatprep.subr.bf16.mxu1 %v3477_v4 }
 0x646   :  { %1359 = vmatpush1.bf16.msra.mxu0 %v3647_v41 }
 0x647   :  { %1360 = vmatprep.subr.bf16.mxu0 %v4181_v34  ;;  %1478 = vmatpush1.bf16.msra.mxu1 %v3482_v53 }
 0x648   :  { %1479 = vmatprep.subr.bf16.mxu1 %v3485_v22 }
 0x64a   :  { %1361 = vmatpush1.bf16.msra.mxu0 %v3653_v23 }
 0x64b   :  { %1362 = vmatprep.subr.bf16.mxu0 %v4181_v34  ;;  %1480 = vmatpush1.bf16.msra.mxu1 %v3490_v54 }
 0x64c   :  { %1481 = vmatprep.subr.bf16.mxu1 %v3493_v6 }
 0x64e   :  { %1363 = vmatpush1.bf16.msra.mxu0 %v3659_v18 }
 0x64f   :  { %1364 = vmatprep.subr.bf16.mxu0 %v4181_v34  ;;  %1482 = vmatpush1.bf16.msra.mxu1 %v3498_v55 }
 0x650   :  { %1483 = vmatprep.subr.bf16.mxu1 %v3501_v42 }
 0x652   :  { %1365 = vmatpush1.bf16.msra.mxu0 %v3665_v25 }
 0x653   :  { %1366 = vmatprep.subr.bf16.mxu0 %v4181_v34  ;;  %1484 = vmatpush1.bf16.msra.mxu1 %v3506_v56 }
 0x654   :  { %1485 = vmatprep.subr.bf16.mxu1 %v3509_v44 }
 0x656   :  { %1367 = vmatpush1.bf16.msra.mxu0 %v3671_v27 }
 0x657   :  { %1368 = vmatprep.subr.bf16.mxu0 %v4181_v34  ;;  %1486 = vmatpush1.bf16.msra.mxu1 %v3514_v57 }
 0x658   :  { %1487 = vmatprep.subr.bf16.mxu1 %v3517_v20 }
 0x65a   :  { %1369 = vmatpush1.bf16.msra.mxu0 %v3677_v16 }
 0x65b   :  { %1506 = vmatprep.subr.bf16.mxu0 %v3365_v3  ;;  %1488 = vmatpush1.bf16.msra.mxu1 %v3681_v29 }
 0x65c   :  { %1547 = vmatprep.subr.bf16.mxu1 %v4181_v34 }
 0x65d   :  { %1379 = vmatmul.mubr.bf16.vlgmr.msra.gmra.mrb[28].mxu0 %v3604_v31  ;;  %v4232_v31 = vld [vmem:[#allocation9_spill] sm:$0xff] }
 0x65e   :  { %1507 = vmatpush1.bf16.msra.mxu0 %v3370_v5 }
 0x65f   :  { %1508 = vmatprep.subr.bf16.mxu0 %v3373_v7 }
 0x662   :  { %1509 = vmatpush1.bf16.msra.mxu0 %v3376_v9 }
 0x663   :  { %1510 = vmatprep.subr.bf16.mxu0 %v3379_v11 }
 0x666   :  { %1511 = vmatpush1.bf16.msra.mxu0 %v3382_v13 }
 0x667   :  { %1512 = vmatprep.subr.bf16.mxu0 %v3530_v58 }
 0x66a   :  { %1513 = vmatpush1.bf16.msra.mxu0 %v3533_v59 }
 0x66b   :  { %1514 = vmatprep.subr.bf16.mxu0 %v3536_v47 }
 0x66e   :  { %1515 = vmatpush1.bf16.msra.mxu0 %v3539_v60 }
 0x66f   :  { %1516 = vmatprep.subr.bf16.mxu0 %v3542_v0 }
 0x672   :  { %1517 = vmatpush1.bf16.msra.mxu0 %v3545_v30 }
 0x673   :  { %1518 = vmatprep.subr.bf16.mxu0 %v3548_v10 }
 0x676   :  { %1519 = vmatpush1.bf16.msra.mxu0 %v3551_v32 }
 0x677   :  { %1520 = vmatprep.subr.bf16.mxu0 %v3554_v61 }
 0x67a   :  { %1521 = vmatpush1.bf16.msra.mxu0 %v3557_v46 }
 0x67b   :  { %1522 = vmatprep.subr.bf16.mxu0 %v3560_v24 }
 0x67e   :  { %1523 = vmatpush1.bf16.msra.mxu0 %v3563_v63 }
 0x67f   :  { %1524 = vmatprep.subr.bf16.mxu0 %v3566_v1 }
 0x682   :  { %1525 = vmatpush1.bf16.msra.mxu0 %v3569_v8 }
 0x683   :  { %1526 = vmatprep.subr.bf16.mxu0 %v4228_v14 }
 0x686   :  { %1527 = vmatpush1.bf16.msra.mxu0 %v4229_v43 }
 0x687   :  { %1528 = vmatprep.subr.bf16.mxu0 %v4230_v37  ;;  %v2504_v37 = vld [vmem:[%s4078_s0 + $0x28] sm:$0xff] }
 0x68a   :  { %1529 = vmatpush1.bf16.msra.mxu0 %v4231_v39 }
 0x68b   :  { %1666 = vmatprep.subr.bf16.mxu0 %v4232_v31 }
 0x700   :  { %v1298_v61 = vpop.f32.mrb[24].mxu0  ;;  %v1339_v46 = vpop.f32.mrb[24].mxu1 }
 0x701   :  { %v1300_v32 = vpop.f32.mrb[25].mxu0  ;;  %v1341_v24 = vpop.f32.mrb[25].mxu1  ;;  %v1406_v8 = vrot.slane %v1339_v46, %v3196_v36 }
 0x702   :  { %v1392_v10 = vcombine.low %v1298_v61, %v1300_v32  ;;  %v1302_v63 = vpop.f32.mrb[26].mxu0  ;;  %v1343_v30 = vpop.f32.mrb[26].mxu1 }
 0x703   :  { %v1303_v1 = vpop.f32.mrb[27].mxu0  ;;  %v1344_v0 = vpop.f32.mrb[27].mxu1 }
 0x704   :  { %v1399_v14 = vrot.slane %v1392_v10, %v3196_v36  ;;  %v4233_v0 = vld [vmem:[#allocation24_spill] sm:$0xff] }
 0x705   :  { %v1416_v61 = vadd.f32 %v1341_v24, %v4233_v0 }
 0x706   :  { %v1407_v39 = vcombine.low %v1399_v14, %v1406_v8 }
 0x708   :  { %v1409_v43 = vadd.f32 %v2504_v37, %v1407_v39 }
 0x70a   :  { %v2506_v31 = vmul.f32 -1.442695, %v1409_v43 }
 0x70c   :  { %2725 = vpow2.f32 %v2506_v31 }
 0x716   :  { %v2726_v60 = vpop.eup %2725 }
 0x717   :  { %v1413_v47 = vadd.f32 1.0, %v2726_v60  ;;  %v2505_v60 = vld [vmem:[%s4078_s0 + $0x30] sm:$0x3] }
 0x718   :  { %v1433_v43 = vrot.slane %v2505_v60, 6 }
 0x719   :  { %2727 = vrcp.f32 %v1413_v47  ;;  %v1432_v47 = vrot.slane %v2504_v37, 6 }
 0x71b   :  { %v1434_v39 = vsel %vm629_vm0, %v1432_v47, %v1433_v43  ;;  %v4237_v47 = vld [vmem:[#allocation8_spill] sm:$0xff]  ;;  %v4238_v43 = vld [vmem:[#allocation13_spill] sm:$0xff] }
 0x723   :  { %v2728_v32 = vpop.eup %2727 }
 0x724   :  { %1439 = vrot.lane.b32.xlu0 %v2728_v32, %s2862_s23 }
 0x730   :  { %v1380_v30 = vpop.f32.mrb[28].mxu0 }
 0x731   :  { %v1417_v46 = vadd.f32 %v1380_v30, %v3209_v40  ;;  %v1382_v10 = vpop.f32.mrb[29].mxu0 }
 0x732   :  { %v1383_v63 = vpop.f32.mrb[30].mxu0 }
 0x733   :  { %v1420_v1 = vcombine.low %v1416_v61, %v1417_v46  ;;  %v1384_v59 = vpop.f32.mrb[31].mxu0 }
 0x735   :  { %v1427_v8 = vrot.slane %v1420_v1, %v3196_v36 }
 0x737   :  { %v1429_v14 = vmul.f32 %v2728_v32, %v1427_v8 }
 0x739   :  { %v1436_v31 = vadd.f32 %v1434_v39, %v1429_v14  ;;  %v4236_v14 = vld [vmem:[#allocation12_spill] sm:$0xff]  ;;  %v4239_v39 = vld [vmem:[#allocation14_spill] sm:$0xff] }
 0x73b   :  { %2729 = vtanh.f32 %v1436_v31  ;;  %v4240_v31 = vld [vmem:[#allocation15_spill] sm:$0xff] }
 0x745   :  { %v2730_v59 = vpop.eup %2729 }
 0x796   :  { %v1440_v24 = vpop.permute.xlu0 %1439 }
 0x797   :  { %v1441_v0 = vrot.slane %v1440_v24, 2  ;;  %v1442_v30 = vrot.slane %v1440_v24, 4  ;;  %v4241_v24 = vld [vmem:[#allocation16_spill] sm:$0xff] }
 0x799   :  { %v1443_v10 = vsel %vm456_vm1, %v1441_v0, %v1442_v30  ;;  %v4235_v0 = vld [vmem:[#allocation11_spill] sm:$0xff]  ;;  %v4242_v30 = vld [vmem:[#allocation17_spill] sm:$0xff] }
 0x79a   :  { %v1445_v61 = vsub.f32 1.0, %v1443_v10  ;;  %v1447_v32 = vmul.f32 %v1443_v10, %v3600_v33  ;;  %v4234_v33 = vld [vmem:[#allocation10_spill] sm:$0xff] }
 0x79b   :  { %v4243_v10 = vld [vmem:[#allocation18_spill] sm:$0xff] }
 0x79c   :  { %v1446_v46 = vmul.f32 %v2730_v59, %v1445_v61  ;;  %v4244_v61 = vld [vmem:[#allocation19_spill] sm:$0xff]  ;;  %v4245_v59 = vld [vmem:[#allocation20_spill] sm:$0xff] }
 0x79e   :  { %v3725_v63 = vadd.f32 %v1447_v32, %v1446_v46  ;;  %v4246_v46 = vld [vmem:[#allocation21_spill] sm:$0xff]  ;;  %v4247_v32 = vld [vmem:[#allocation22_spill] sm:$0xff] }
 0x7a0   :  { %v1456_v37 = vrot.slane %v3725_v63, %v3196_v36 }
 0x7a2   :  { %v1457_v1 = vcombine.high %v1456_v37, %v1456_v37  ;;  %v1460_v60 = vpack.c.bf16 %v1456_v37, %v1456_v37  ;;  %v4248_v37 = vld [vmem:[#allocation23_spill] sm:$0xff] }
 0x7a4   :  { %v1461_v8 = vpack.c.bf16 %v1457_v1, %v1457_v1  ;;  %v4249_v1 = vld [vmem:[#allocation25_spill] sm:$0xff] }
 0x7a6   :  { %2507 = vmatprep.mubr.msk.bf16.mxu1 %vm456_vm1, %v1461_v8  ;;  %2508 = vmatprep.mubr.msk.bf16.mxu0 %vm456_vm1, %v1461_v8 }
 0x7a7   :  { %1498 = vmatmul.mubr.bf16.vlgmr.msra.gmra.mrb[28].mxu1 %v1460_v60  ;;  %1539 = vmatmul.mubr.bf16.vlgmr.msra.gmra.mrb[32].mxu0 %v1460_v60 }
 0x7a8   :  { %1548 = vmatpush1.bf16.msra.mxu1 %v3610_v12  ;;  %2509 = vmatprep.mubr.msk.bf16.mxu1 %vm456_vm1, %v1461_v8  ;;  %v4250_v8 = vld [vmem:[#allocation26_spill] sm:$0xff] }
 0x7a9   :  { %1549 = vmatprep.subr.bf16.mxu1 %v4181_v34  ;;  %1667 = vmatpush1.bf16.msra.mxu0 %v3434_v62 }
 0x7aa   :  { %1668 = vmatprep.subr.bf16.mxu0 %v3437_v45 }
 0x7ac   :  { %1550 = vmatpush1.bf16.msra.mxu1 %v3617_v35 }
 0x7ad   :  { %1551 = vmatprep.subr.bf16.mxu1 %v4181_v34  ;;  %1669 = vmatpush1.bf16.msra.mxu0 %v3442_v38 }
 0x7ae   :  { %1670 = vmatprep.subr.bf16.mxu0 %v3445_v49 }
 0x7b0   :  { %1552 = vmatpush1.bf16.msra.mxu1 %v3623_v21 }
 0x7b1   :  { %1553 = vmatprep.subr.bf16.mxu1 %v4181_v34  ;;  %1671 = vmatpush1.bf16.msra.mxu0 %v3450_v48 }
 0x7b2   :  { %1672 = vmatprep.subr.bf16.mxu0 %v3453_v2 }
 0x7b4   :  { %1554 = vmatpush1.bf16.msra.mxu1 %v3629_v15 }
 0x7b5   :  { %1555 = vmatprep.subr.bf16.mxu1 %v4181_v34  ;;  %1673 = vmatpush1.bf16.msra.mxu0 %v3458_v50 }
 0x7b6   :  { %1674 = vmatprep.subr.bf16.mxu0 %v3461_v28 }
 0x7b8   :  { %1556 = vmatpush1.bf16.msra.mxu1 %v3635_v17 }
 0x7b9   :  { %1557 = vmatprep.subr.bf16.mxu1 %v4181_v34  ;;  %1675 = vmatpush1.bf16.msra.mxu0 %v3466_v51 }
 0x7ba   :  { %1676 = vmatprep.subr.bf16.mxu0 %v3469_v26 }
 0x7bc   :  { %1558 = vmatpush1.bf16.msra.mxu1 %v3641_v19 }
 0x7bd   :  { %1559 = vmatprep.subr.bf16.mxu1 %v4181_v34  ;;  %1677 = vmatpush1.bf16.msra.mxu0 %v3474_v52 }
 0x7be   :  { %1678 = vmatprep.subr.bf16.mxu0 %v3477_v4 }
 0x7c0   :  { %1560 = vmatpush1.bf16.msra.mxu1 %v3647_v41 }
 0x7c1   :  { %1561 = vmatprep.subr.bf16.mxu1 %v4181_v34  ;;  %1679 = vmatpush1.bf16.msra.mxu0 %v3482_v53 }
 0x7c2   :  { %1680 = vmatprep.subr.bf16.mxu0 %v3485_v22 }
 0x7c4   :  { %1562 = vmatpush1.bf16.msra.mxu1 %v3653_v23 }
 0x7c5   :  { %1563 = vmatprep.subr.bf16.mxu1 %v4181_v34  ;;  %1681 = vmatpush1.bf16.msra.mxu0 %v3490_v54 }
 0x7c6   :  { %1682 = vmatprep.subr.bf16.mxu0 %v3493_v6 }
 0x7c8   :  { %1564 = vmatpush1.bf16.msra.mxu1 %v3659_v18 }
 0x7c9   :  { %1565 = vmatprep.subr.bf16.mxu1 %v4181_v34  ;;  %1683 = vmatpush1.bf16.msra.mxu0 %v3498_v55 }
 0x7ca   :  { %1684 = vmatprep.subr.bf16.mxu0 %v3501_v42 }
 0x7cc   :  { %1566 = vmatpush1.bf16.msra.mxu1 %v3665_v25 }
 0x7cd   :  { %1567 = vmatprep.subr.bf16.mxu1 %v4181_v34  ;;  %1685 = vmatpush1.bf16.msra.mxu0 %v3506_v56 }
 0x7ce   :  { %1686 = vmatprep.subr.bf16.mxu0 %v3509_v44 }
 0x7d0   :  { %1568 = vmatpush1.bf16.msra.mxu1 %v3671_v27 }
 0x7d1   :  { %1569 = vmatprep.subr.bf16.mxu1 %v4181_v34  ;;  %1687 = vmatpush1.bf16.msra.mxu0 %v3514_v57 }
 0x7d2   :  { %1688 = vmatprep.subr.bf16.mxu0 %v3517_v20 }
 0x7d4   :  { %1570 = vmatpush1.bf16.msra.mxu1 %v3677_v16 }
 0x7d5   :  { %1707 = vmatprep.subr.bf16.mxu1 %v3365_v3  ;;  %1689 = vmatpush1.bf16.msra.mxu0 %v3681_v29 }
 0x7d6   :  { %1748 = vmatprep.subr.bf16.mxu0 %v4181_v34 }
 0x7d7   :  { %1580 = vmatmul.mubr.bf16.vlgmr.msra.gmra.mrb[32].mxu1 %v1460_v60  ;;  %v4251_v60 = vld [vmem:[#allocation9_spill] sm:$0xff] }
 0x7d8   :  { %1708 = vmatpush1.bf16.msra.mxu1 %v3370_v5 }
 0x7d9   :  { %1709 = vmatprep.subr.bf16.mxu1 %v3373_v7 }
 0x7dc   :  { %1710 = vmatpush1.bf16.msra.mxu1 %v3376_v9 }
 0x7dd   :  { %1711 = vmatprep.subr.bf16.mxu1 %v3379_v11 }
 0x7e0   :  { %1712 = vmatpush1.bf16.msra.mxu1 %v3382_v13 }
 0x7e1   :  { %1713 = vmatprep.subr.bf16.mxu1 %v3530_v58 }
 0x7e4   :  { %1714 = vmatpush1.bf16.msra.mxu1 %v4234_v33 }
 0x7e5   :  { %1715 = vmatprep.subr.bf16.mxu1 %v4235_v0 }
 0x7e8   :  { %1716 = vmatpush1.bf16.msra.mxu1 %v4236_v14 }
 0x7e9   :  { %1717 = vmatprep.subr.bf16.mxu1 %v4237_v47 }
 0x7ec   :  { %1718 = vmatpush1.bf16.msra.mxu1 %v4238_v43 }
 0x7ed   :  { %1719 = vmatprep.subr.bf16.mxu1 %v4239_v39 }
 0x7f0   :  { %1720 = vmatpush1.bf16.msra.mxu1 %v4240_v31 }
 0x7f1   :  { %1721 = vmatprep.subr.bf16.mxu1 %v4241_v24 }
 0x7f4   :  { %1722 = vmatpush1.bf16.msra.mxu1 %v4242_v30 }
 0x7f5   :  { %1723 = vmatprep.subr.bf16.mxu1 %v4243_v10 }
 0x7f8   :  { %1724 = vmatpush1.bf16.msra.mxu1 %v4244_v61 }
 0x7f9   :  { %1725 = vmatprep.subr.bf16.mxu1 %v4245_v59 }
 0x7fc   :  { %1726 = vmatpush1.bf16.msra.mxu1 %v4246_v46 }
 0x7fd   :  { %1727 = vmatprep.subr.bf16.mxu1 %v4247_v32 }
 0x800   :  { %1728 = vmatpush1.bf16.msra.mxu1 %v4248_v37 }
 0x801   :  { %1729 = vmatprep.subr.bf16.mxu1 %v4249_v1  ;;  %v2510_v1 = vld [vmem:[%s4078_s0 + $0x32] sm:$0xff] }
 0x804   :  { %1730 = vmatpush1.bf16.msra.mxu1 %v4250_v8 }
 0x805   :  { %1867 = vmatprep.subr.bf16.mxu1 %v4251_v60 }
 0x87a   :  { %v1499_v24 = vpop.f32.mrb[28].mxu1  ;;  %v1540_v30 = vpop.f32.mrb[32].mxu0 }
 0x87b   :  { %v1501_v31 = vpop.f32.mrb[29].mxu1  ;;  %v1542_v10 = vpop.f32.mrb[33].mxu0  ;;  %v1607_v46 = vrot.slane %v1540_v30, %v3196_v36 }
 0x87c   :  { %v1593_v39 = vcombine.low %v1499_v24, %v1501_v31  ;;  %v1503_v61 = vpop.f32.mrb[30].mxu1  ;;  %v1544_v43 = vpop.f32.mrb[34].mxu0 }
 0x87d   :  { %v1504_v59 = vpop.f32.mrb[31].mxu1  ;;  %v1545_v47 = vpop.f32.mrb[35].mxu0 }
 0x87e   :  { %v1600_v32 = vrot.slane %v1593_v39, %v3196_v36  ;;  %v4252_v47 = vld [vmem:[#allocation24_spill] sm:$0xff] }
 0x87f   :  { %v1617_v24 = vadd.f32 %v1542_v10, %v4252_v47 }
 0x880   :  { %v1608_v8 = vcombine.low %v1600_v32, %v1607_v46 }
 0x882   :  { %v1610_v37 = vadd.f32 %v2510_v1, %v1608_v8 }
 0x884   :  { %v2512_v60 = vmul.f32 -1.442695, %v1610_v37 }
 0x886   :  { %2731 = vpow2.f32 %v2512_v60 }
 0x890   :  { %v2732_v14 = vpop.eup %2731 }
 0x891   :  { %v1614_v0 = vadd.f32 1.0, %v2732_v14  ;;  %v2511_v14 = vld [vmem:[%s4078_s0 + $0x3a] sm:$0x3] }
 0x892   :  { %v1634_v37 = vrot.slane %v2511_v14, 6 }
 0x893   :  { %2733 = vrcp.f32 %v1614_v0  ;;  %v1633_v0 = vrot.slane %v2510_v1, 6 }
 0x895   :  { %v1635_v8 = vsel %vm629_vm0, %v1633_v0, %v1634_v37 }
 0x89d   :  { %v2734_v31 = vpop.eup %2733 }
 0x89e   :  { %1640 = vrot.lane.b32.xlu1 %v2734_v31, %s2862_s23 }
 0x8aa   :  { %v1581_v43 = vpop.f32.mrb[32].mxu1 }
 0x8ab   :  { %v1618_v30 = vadd.f32 %v1581_v43, %v3209_v40  ;;  %v1583_v39 = vpop.f32.mrb[33].mxu1 }
 0x8ac   :  { %v1584_v61 = vpop.f32.mrb[34].mxu1 }
 0x8ad   :  { %v1621_v59 = vcombine.low %v1617_v24, %v1618_v30  ;;  %v1585_v33 = vpop.f32.mrb[35].mxu1 }
 0x8af   :  { %v1628_v46 = vrot.slane %v1621_v59, %v3196_v36 }
 0x8b1   :  { %v1630_v32 = vmul.f32 %v2734_v31, %v1628_v46 }
 0x8b3   :  { %v1637_v60 = vadd.f32 %v1635_v8, %v1630_v32 }
 0x8b5   :  { %2735 = vtanh.f32 %v1637_v60  ;;  %v4270_v60 = vld [vmem:[#allocation24_spill] sm:$0xff] }
 0x8bf   :  { %v2736_v33 = vpop.eup %2735 }
 0x910   :  { %v1641_v10 = vpop.permute.xlu1 %1640 }
 0x911   :  { %v1642_v47 = vrot.slane %v1641_v10, 2  ;;  %v1643_v43 = vrot.slane %v1641_v10, 4 }
 0x913   :  { %v1644_v39 = vsel %vm456_vm1, %v1642_v47, %v1643_v43 }
 0x914   :  { %v1646_v24 = vsub.f32 1.0, %v1644_v39  ;;  %v1648_v31 = vmul.f32 %v1644_v39, %v3725_v63 }
 0x916   :  { %v1647_v30 = vmul.f32 %v2736_v33, %v1646_v24 }
 0x918   :  { %v3819_v61 = vadd.f32 %v1648_v31, %v1647_v30 }
 0x91a   :  { %v1657_v1 = vrot.slane %v3819_v61, %v3196_v36 }
 0x91c   :  { %v1658_v59 = vcombine.high %v1657_v1, %v1657_v1  ;;  %v1661_v14 = vpack.c.bf16 %v1657_v1, %v1657_v1 }
 0x91e   :  { %v1662_v46 = vpack.c.bf16 %v1658_v59, %v1658_v59  ;;  %v2517_v59 = vld [vmem:[%s4078_s0 + $0x44] sm:$0x3] }
 0x920   :  { %2513 = vmatprep.mubr.msk.bf16.mxu0 %vm456_vm1, %v1662_v46  ;;  %2514 = vmatprep.mubr.msk.bf16.mxu1 %vm456_vm1, %v1662_v46 }
 0x921   :  { %1699 = vmatmul.mubr.bf16.vlgmr.msra.gmra.mrb[36].mxu0 %v1661_v14  ;;  %1740 = vmatmul.mubr.bf16.vlgmr.msra.gmra.mrb[36].mxu1 %v1661_v14 }
 0x922   :  { %1749 = vmatpush1.bf16.msra.mxu0 %v3610_v12  ;;  %2515 = vmatprep.mubr.msk.bf16.mxu0 %vm456_vm1, %v1662_v46 }
 0x923   :  { %1750 = vmatprep.subr.bf16.mxu0 %v4181_v34  ;;  %1868 = vmatpush1.bf16.msra.mxu1 %v3434_v62  ;;  %v4253_v62 = vld [vmem:[#allocation10_spill] sm:$0xff] }
 0x924   :  { %1869 = vmatprep.subr.bf16.mxu1 %v3437_v45  ;;  %v4255_v45 = vld [vmem:[#allocation12_spill] sm:$0xff] }
 0x926   :  { %1751 = vmatpush1.bf16.msra.mxu0 %v3617_v35 }
 0x927   :  { %1752 = vmatprep.subr.bf16.mxu0 %v4181_v34  ;;  %1870 = vmatpush1.bf16.msra.mxu1 %v3442_v38  ;;  %v4256_v38 = vld [vmem:[#allocation8_spill] sm:$0xff] }
 0x928   :  { %1871 = vmatprep.subr.bf16.mxu1 %v3445_v49  ;;  %v4257_v49 = vld [vmem:[#allocation13_spill] sm:$0xff] }
 0x92a   :  { %1753 = vmatpush1.bf16.msra.mxu0 %v3623_v21 }
 0x92b   :  { %1754 = vmatprep.subr.bf16.mxu0 %v4181_v34  ;;  %1872 = vmatpush1.bf16.msra.mxu1 %v3450_v48  ;;  %v4263_v48 = vld [vmem:[#allocation19_spill] sm:$0xff] }
 0x92c   :  { %1873 = vmatprep.subr.bf16.mxu1 %v3453_v2  ;;  %v4264_v2 = vld [vmem:[#allocation20_spill] sm:$0xff] }
 0x92e   :  { %1755 = vmatpush1.bf16.msra.mxu0 %v3629_v15 }
 0x92f   :  { %1756 = vmatprep.subr.bf16.mxu0 %v4181_v34  ;;  %1874 = vmatpush1.bf16.msra.mxu1 %v3458_v50  ;;  %v4265_v50 = vld [vmem:[#allocation21_spill] sm:$0xff] }
 0x930   :  { %1875 = vmatprep.subr.bf16.mxu1 %v3461_v28  ;;  %v4266_v28 = vld [vmem:[#allocation22_spill] sm:$0xff] }
 0x932   :  { %1757 = vmatpush1.bf16.msra.mxu0 %v3635_v17 }
 0x933   :  { %1758 = vmatprep.subr.bf16.mxu0 %v4181_v34  ;;  %1876 = vmatpush1.bf16.msra.mxu1 %v3466_v51  ;;  %v4267_v51 = vld [vmem:[#allocation23_spill] sm:$0xff] }
 0x934   :  { %1877 = vmatprep.subr.bf16.mxu1 %v3469_v26  ;;  %v4268_v26 = vld [vmem:[#allocation25_spill] sm:$0xff] }
 0x936   :  { %1759 = vmatpush1.bf16.msra.mxu0 %v3641_v19 }
 0x937   :  { %1760 = vmatprep.subr.bf16.mxu0 %v4181_v34  ;;  %1878 = vmatpush1.bf16.msra.mxu1 %v3474_v52  ;;  %v4269_v52 = vld [vmem:[#allocation26_spill] sm:$0xff] }
 0x938   :  { %1879 = vmatprep.subr.bf16.mxu1 %v3477_v4 }
 0x93a   :  { %1761 = vmatpush1.bf16.msra.mxu0 %v3647_v41 }
 0x93b   :  { %1762 = vmatprep.subr.bf16.mxu0 %v4181_v34  ;;  %1880 = vmatpush1.bf16.msra.mxu1 %v3482_v53 }
 0x93c   :  { %1881 = vmatprep.subr.bf16.mxu1 %v3485_v22 }
 0x93e   :  { %1763 = vmatpush1.bf16.msra.mxu0 %v3653_v23 }
 0x93f   :  { %1764 = vmatprep.subr.bf16.mxu0 %v4181_v34  ;;  %1882 = vmatpush1.bf16.msra.mxu1 %v3490_v54 }
 0x940   :  { %1883 = vmatprep.subr.bf16.mxu1 %v3493_v6 }
 0x942   :  { %1765 = vmatpush1.bf16.msra.mxu0 %v3659_v18 }
 0x943   :  { %1766 = vmatprep.subr.bf16.mxu0 %v4181_v34  ;;  %1884 = vmatpush1.bf16.msra.mxu1 %v3498_v55 }
 0x944   :  { %1885 = vmatprep.subr.bf16.mxu1 %v3501_v42 }
 0x946   :  { %1767 = vmatpush1.bf16.msra.mxu0 %v3665_v25 }
 0x947   :  { %1768 = vmatprep.subr.bf16.mxu0 %v4181_v34  ;;  %1886 = vmatpush1.bf16.msra.mxu1 %v3506_v56 }
 0x948   :  { %1887 = vmatprep.subr.bf16.mxu1 %v3509_v44 }
 0x94a   :  { %1769 = vmatpush1.bf16.msra.mxu0 %v3671_v27 }
 0x94b   :  { %1770 = vmatprep.subr.bf16.mxu0 %v4181_v34  ;;  %1888 = vmatpush1.bf16.msra.mxu1 %v3514_v57 }
 0x94c   :  { %1889 = vmatprep.subr.bf16.mxu1 %v3517_v20 }
 0x94e   :  { %1771 = vmatpush1.bf16.msra.mxu0 %v3677_v16 }
 0x94f   :  { %1908 = vmatprep.subr.bf16.mxu0 %v3365_v3  ;;  %1890 = vmatpush1.bf16.msra.mxu1 %v3681_v29  ;;  %v4254_v3 = vld [vmem:[#allocation11_spill] sm:$0xff] }
 0x950   :  { %1949 = vmatprep.subr.bf16.mxu1 %v4181_v34 }
 0x951   :  { %1781 = vmatmul.mubr.bf16.vlgmr.msra.gmra.mrb[40].mxu0 %v1661_v14  ;;  %v1835_v14 = vrot.slane %v2517_v59, 6 }
 0x952   :  { %1909 = vmatpush1.bf16.msra.mxu0 %v3370_v5  ;;  %v4258_v5 = vld [vmem:[#allocation14_spill] sm:$0xff] }
 0x953   :  { %1910 = vmatprep.subr.bf16.mxu0 %v3373_v7  ;;  %v4259_v7 = vld [vmem:[#allocation15_spill] sm:$0xff] }
 0x956   :  { %1911 = vmatpush1.bf16.msra.mxu0 %v3376_v9  ;;  %v4260_v9 = vld [vmem:[#allocation16_spill] sm:$0xff] }
 0x957   :  { %1912 = vmatprep.subr.bf16.mxu0 %v3379_v11  ;;  %v4261_v11 = vld [vmem:[#allocation17_spill] sm:$0xff] }
 0x95a   :  { %1913 = vmatpush1.bf16.msra.mxu0 %v3382_v13  ;;  %v4262_v13 = vld [vmem:[#allocation18_spill] sm:$0xff] }
 0x95b   :  { %1914 = vmatprep.subr.bf16.mxu0 %v3530_v58  ;;  %v2516_v58 = vld [vmem:[%s4078_s0 + $0x3c] sm:$0xff] }
 0x95c   :  { %v1834_v46 = vrot.slane %v2516_v58, 6 }
 0x95e   :  { %1915 = vmatpush1.bf16.msra.mxu0 %v4253_v62  ;;  %v1836_v62 = vsel %vm629_vm0, %v1834_v46, %v1835_v14 }
 0x95f   :  { %1916 = vmatprep.subr.bf16.mxu0 %v4254_v3 }
 0x962   :  { %1917 = vmatpush1.bf16.msra.mxu0 %v4255_v45 }
 0x963   :  { %1918 = vmatprep.subr.bf16.mxu0 %v4256_v38 }
 0x966   :  { %1919 = vmatpush1.bf16.msra.mxu0 %v4257_v49 }
 0x967   :  { %1920 = vmatprep.subr.bf16.mxu0 %v4258_v5 }
 0x96a   :  { %1921 = vmatpush1.bf16.msra.mxu0 %v4259_v7 }
 0x96b   :  { %1922 = vmatprep.subr.bf16.mxu0 %v4260_v9 }
 0x96e   :  { %1923 = vmatpush1.bf16.msra.mxu0 %v4261_v11 }
 0x96f   :  { %1924 = vmatprep.subr.bf16.mxu0 %v4262_v13 }
 0x972   :  { %1925 = vmatpush1.bf16.msra.mxu0 %v4263_v48 }
 0x973   :  { %1926 = vmatprep.subr.bf16.mxu0 %v4264_v2 }
 0x976   :  { %1927 = vmatpush1.bf16.msra.mxu0 %v4265_v50 }
 0x977   :  { %1928 = vmatprep.subr.bf16.mxu0 %v4266_v28 }
 0x97a   :  { %1929 = vmatpush1.bf16.msra.mxu0 %v4267_v51 }
 0x97b   :  { %1930 = vmatprep.subr.bf16.mxu0 %v4268_v26 }
 0x97e   :  { %1931 = vmatpush1.bf16.msra.mxu0 %v4269_v52 }
 0x97f   :  { %2165 = vmatprep.subr.bf16.mxu0 %v4181_v34 }
 0x9f4   :  { %v1700_v4 = vpop.f32.mrb[36].mxu0  ;;  %v1741_v53 = vpop.f32.mrb[36].mxu1 }
 0x9f5   :  { %v1702_v22 = vpop.f32.mrb[37].mxu0  ;;  %v1743_v54 = vpop.f32.mrb[37].mxu1  ;;  %v1808_v57 = vrot.slane %v1741_v53, %v3196_v36 }
 0x9f6   :  { %v1794_v6 = vcombine.low %v1700_v4, %v1702_v22  ;;  %v1704_v55 = vpop.f32.mrb[38].mxu0  ;;  %v1745_v42 = vpop.f32.mrb[38].mxu1  ;;  %v1818_v10 = vadd.f32 %v1743_v54, %v4270_v60 }
 0x9f7   :  { %v1705_v56 = vpop.f32.mrb[39].mxu0  ;;  %v1746_v44 = vpop.f32.mrb[39].mxu1 }
 0x9f8   :  { %v1801_v20 = vrot.slane %v1794_v6, %v3196_v36  ;;  %v2522_v6 = vld [vmem:[%s4078_s0 + $0x46] sm:$0xff] }
 0x9fa   :  { %v1809_v29 = vcombine.low %v1801_v20, %v1808_v57  ;;  %v2689_v20 = vld [vmem:[%s4081_s3 + $0x40] sm:$0xff]  }
 0x9fc   :  { %v1811_v63 = vadd.f32 %v2516_v58, %v1809_v29  ;;  %v2690_v58 = vld [vmem:[%s4081_s3 + $0x48] sm:$0xff]   ;;  %v2691_v29 = vld [vmem:[%s4081_s3 + $0x50] sm:$0xff]  }
 0x9fe   :  { %v2518_v47 = vmul.f32 -1.442695, %v1811_v63  ;;  %v2692_v63 = vld [vmem:[%s4081_s3 + $0x58] sm:$0xff]  }
 0xa00   :  { %2737 = vpow2.f32 %v2518_v47 }
 0xa0a   :  { %v2738_v32 = vpop.eup %2737 }
 0xa0b   :  { %v1815_v0 = vadd.f32 1.0, %v2738_v32  ;;  %v2693_v32 = vld [vmem:[%s4085_s7] sm:$0xff]  }
 0xa0d   :  { %2739 = vrcp.f32 %v1815_v0  ;;  %v2863_v0 = vmov 0.0  }
 0xa17   :  { %v2740_v37 = vpop.eup %2739 }
 0xa18   :  { %1841 = vrot.lane.b32.xlu0 %v2740_v37, %s2862_s23 }
 0xa24   :  { %v1782_v8 = vpop.f32.mrb[40].mxu0 }
 0xa25   :  { %v1819_v43 = vadd.f32 %v1782_v8, %v3209_v40  ;;  %v1784_v39 = vpop.f32.mrb[41].mxu0 }
 0xa26   :  { %v1785_v24 = vpop.f32.mrb[42].mxu0 }
 0xa27   :  { %v1822_v33 = vcombine.low %v1818_v10, %v1819_v43  ;;  %v1786_v30 = vpop.f32.mrb[43].mxu0 }
 0xa29   :  { %v1829_v31 = vrot.slane %v1822_v33, %v3196_v36 }
 0xa2b   :  { %v1831_v1 = vmul.f32 %v2740_v37, %v1829_v31  ;;  %v2523_v31 = vld [vmem:[%s4078_s0 + $0x4e] sm:$0x3] }
 0xa2c   :  { %v2036_v59 = vrot.slane %v2523_v31, 6 }
 0xa2d   :  { %v1838_v3 = vadd.f32 %v1836_v62, %v1831_v1  ;;  %v2035_v1 = vrot.slane %v2522_v6, 6 }
 0xa2f   :  { %2741 = vtanh.f32 %v1838_v3  ;;  %v2037_v46 = vsel %vm629_vm0, %v2035_v1, %v2036_v59 }
 0xa39   :  { %v2742_v9 = vpop.eup %2741 }
 0xa8a   :  { %v1842_v45 = vpop.permute.xlu0 %1841 }
 0xa8b   :  { %v1843_v38 = vrot.slane %v1842_v45, 2  ;;  %v1844_v49 = vrot.slane %v1842_v45, 4 }
 0xa8d   :  { %v1845_v5 = vsel %vm456_vm1, %v1843_v38, %v1844_v49 }
 0xa8e   :  { %v1847_v7 = vsub.f32 1.0, %v1845_v5  ;;  %v1849_v13 = vmul.f32 %v1845_v5, %v3819_v61 }
 0xa90   :  { %v1848_v11 = vmul.f32 %v2742_v9, %v1847_v7 }
 0xa92   :  { %v3913_v48 = vadd.f32 %v1849_v13, %v1848_v11 }
 0xa94   :  { %v1858_v2 = vrot.slane %v3913_v48, %v3196_v36 }
 0xa96   :  { %v1859_v50 = vcombine.high %v1858_v2, %v1858_v2  ;;  %v1862_v51 = vpack.c.bf16 %v1858_v2, %v1858_v2 }
 0xa98   :  { %v1863_v28 = vpack.c.bf16 %v1859_v50, %v1859_v50  ;;  %v2694_v50 = vld [vmem:[%s4085_s7 + $0x8] sm:$0xff]  }
 0xa9a   :  { %2519 = vmatprep.mubr.msk.bf16.mxu1 %vm456_vm1, %v1863_v28  ;;  %2520 = vmatprep.mubr.msk.bf16.mxu0 %vm456_vm1, %v1863_v28 }
 0xa9b   :  { %1900 = vmatmul.mubr.bf16.vlgmr.msra.gmra.mrb[40].mxu1 %v1862_v51  ;;  %1941 = vmatmul.mubr.bf16.vlgmr.msra.gmra.mrb[44].mxu0 %v1862_v51 }
 0xa9c   :  { %1950 = vmatpush1.bf16.msra.mxu1 %v3610_v12  ;;  %2521 = vmatprep.mubr.msk.bf16.mxu1 %vm456_vm1, %v1863_v28  ;;  %v2681_v12 = vld [vmem:[%s4081_s3] sm:$0xff]  }
 0xa9d   :  { %1951 = vmatprep.subr.bf16.mxu1 %v4181_v34  ;;  %2166 = vmatpush1.bf16.msra.mxu0 %v2681_v12  ;;  %v2089_v28 = vld [vmem:[%s4082_s4] sm:$0x3] }
 0xa9e   :  { %2167 = vmatprep.subr.bf16.mxu0 %v4181_v34  ;;  %v2538_v12 = vld [vmem:[%s4083_s5] ss:$0 sm:$0xff] }
 0xaa0   :  { %1952 = vmatpush1.bf16.msra.mxu1 %v3617_v35  ;;  %v2682_v35 = vld [vmem:[%s4081_s3 + $0x8] sm:$0xff]  }
 0xaa1   :  { %1953 = vmatprep.subr.bf16.mxu1 %v4181_v34  ;;  %2168 = vmatpush1.bf16.msra.mxu0 %v2682_v35 }
 0xaa2   :  { %2169 = vmatprep.subr.bf16.mxu0 %v4181_v34 }
 0xaa4   :  { %1954 = vmatpush1.bf16.msra.mxu1 %v3623_v21  ;;  %v2683_v21 = vld [vmem:[%s4081_s3 + $0x10] sm:$0xff]  }
 0xaa5   :  { %1955 = vmatprep.subr.bf16.mxu1 %v4181_v34  ;;  %2170 = vmatpush1.bf16.msra.mxu0 %v2683_v21 }
 0xaa6   :  { %2171 = vmatprep.subr.bf16.mxu0 %v4181_v34 }
 0xaa8   :  { %1956 = vmatpush1.bf16.msra.mxu1 %v3629_v15  ;;  %v2684_v15 = vld [vmem:[%s4081_s3 + $0x18] sm:$0xff]  }
 0xaa9   :  { %1957 = vmatprep.subr.bf16.mxu1 %v4181_v34  ;;  %2172 = vmatpush1.bf16.msra.mxu0 %v2684_v15  ;;  %v2539_v15 = vld [vmem:[%s4084_s6] ss:$0 sm:$0xff] }
 0xaaa   :  { %2173 = vmatprep.subr.bf16.mxu0 %v4181_v34 }
 0xaac   :  { %1958 = vmatpush1.bf16.msra.mxu1 %v3635_v17  ;;  %v2685_v17 = vld [vmem:[%s4081_s3 + $0x20] sm:$0xff]  }
 0xaad   :  { %1959 = vmatprep.subr.bf16.mxu1 %v4181_v34  ;;  %2174 = vmatpush1.bf16.msra.mxu0 %v2685_v17 }
 0xaae   :  { %2175 = vmatprep.subr.bf16.mxu0 %v4181_v34 }
 0xab0   :  { %1960 = vmatpush1.bf16.msra.mxu1 %v3641_v19  ;;  %v2686_v19 = vld [vmem:[%s4081_s3 + $0x28] sm:$0xff]  }
 0xab1   :  { %1961 = vmatprep.subr.bf16.mxu1 %v4181_v34  ;;  %2176 = vmatpush1.bf16.msra.mxu0 %v2686_v19 }
 0xab2   :  { %2177 = vmatprep.subr.bf16.mxu0 %v4181_v34 }
 0xab4   :  { %1962 = vmatpush1.bf16.msra.mxu1 %v3647_v41  ;;  %v2687_v41 = vld [vmem:[%s4081_s3 + $0x30] sm:$0xff]  }
 0xab5   :  { %1963 = vmatprep.subr.bf16.mxu1 %v4181_v34  ;;  %2178 = vmatpush1.bf16.msra.mxu0 %v2687_v41 }
 0xab6   :  { %2179 = vmatprep.subr.bf16.mxu0 %v4181_v34 }
 0xab8   :  { %1964 = vmatpush1.bf16.msra.mxu1 %v3653_v23  ;;  %v2688_v23 = vld [vmem:[%s4081_s3 + $0x38] sm:$0xff]  }
 0xab9   :  { %1965 = vmatprep.subr.bf16.mxu1 %v4181_v34  ;;  %2180 = vmatpush1.bf16.msra.mxu0 %v2688_v23 }
 0xaba   :  { %2181 = vmatprep.subr.bf16.mxu0 %v4181_v34 }
 0xabc   :  { %1966 = vmatpush1.bf16.msra.mxu1 %v3659_v18 }
 0xabd   :  { %1967 = vmatprep.subr.bf16.mxu1 %v4181_v34  ;;  %2182 = vmatpush1.bf16.msra.mxu0 %v2689_v20 }
 0xabe   :  { %2183 = vmatprep.subr.bf16.mxu0 %v4181_v34 }
 0xac0   :  { %1968 = vmatpush1.bf16.msra.mxu1 %v3665_v25 }
 0xac1   :  { %1969 = vmatprep.subr.bf16.mxu1 %v4181_v34  ;;  %2184 = vmatpush1.bf16.msra.mxu0 %v2690_v58  ;;  %v2548_v58 = vld [vmem:[%s4090_s12] ss:$0 sm:$0xff] }
 0xac2   :  { %2185 = vmatprep.subr.bf16.mxu0 %v4181_v34 }
 0xac4   :  { %1970 = vmatpush1.bf16.msra.mxu1 %v3671_v27 }
 0xac5   :  { %1971 = vmatprep.subr.bf16.mxu1 %v4181_v34  ;;  %2186 = vmatpush1.bf16.msra.mxu0 %v2691_v29 }
 0xac6   :  { %2187 = vmatprep.subr.bf16.mxu0 %v4181_v34 }
 0xac8   :  { %1972 = vmatpush1.bf16.msra.mxu1 %v3677_v16 }
 0xac9   :  { %2188 = vmatpush1.bf16.msra.mxu0 %v2692_v63  ;;  %2564 = vmatprep.subr.bf16.mxu1 %v2863_v0 }
 0xacb   :  { %1982 = vmatmul.mubr.bf16.vlgmr.msra.gmra.mrb[44].mxu1 %v1862_v51 }
 0xacc   :  { %2565 = vmatpush3.bf16.msra.mxu1 %v2693_v32  ;;  %2572 = vmatprep.mubr.msk.bf16.mxu1 %vm2864_vm2, %v2863_v0 }
 0xacd   :  { %2566 = vmatprep.subr.bf16.mxu1 %v2863_v0 }
 0xad0   :  { %2567 = vmatpush3.bf16.msra.mxu1 %v2694_v50 }
 0xad1   :  { %2568 = vmatprep.subr.bf16.mxu1 %v2863_v0 }
 0xb6e   :  { %v1901_v18 = vpop.f32.mrb[40].mxu1  ;;  %v1942_v25 = vpop.f32.mrb[44].mxu0 }
 0xb6f   :  { %v1903_v27 = vpop.f32.mrb[41].mxu1  ;;  %v1944_v16 = vpop.f32.mrb[45].mxu0  ;;  %v2009_v22 = vrot.slane %v1942_v25, %v3196_v36  ;;  %v2697_v25 = vld [vmem:[%s4089_s11] sm:$0xff]  }
 0xb70   :  { %v1995_v61 = vcombine.low %v1901_v18, %v1903_v27  ;;  %v1905_v26 = vpop.f32.mrb[42].mxu1  ;;  %v1946_v52 = vpop.f32.mrb[46].mxu0  ;;  %v2019_v8 = vadd.f32 %v1944_v16, %v4270_v60  ;;  %v2698_v16 = vld [vmem:[%s4089_s11 + $0x8] sm:$0xff]  }
 0xb71   :  { %v1906_v4 = vpop.f32.mrb[43].mxu1  ;;  %v1947_v53 = vpop.f32.mrb[47].mxu0  ;;  %v2700_v26 = vld [vmem:[%s4089_s11 + $0x18] sm:$0xff]   ;;  %v2540_v52 = vld [vmem:[%s4086_s8] ss:$0 sm:$0xff] }
 0xb72   :  { %v2002_v54 = vrot.slane %v1995_v61, %v3196_v36  ;;  %v2699_v61 = vld [vmem:[%s4089_s11 + $0x10] sm:$0xff]   ;;  %v2546_v53 = vld [vmem:[%s4087_s9] ss:$0 sm:$0xff]  ;;  %s2413_s9 = sshll.u32 %s2865_s26, 4  ;;  %s2414_s9 = int_to_ptr.vmem [resolvable:$true] %s2413_s9 }
 0xb73   :  { %p2836_p9 = scmp.lt.s32.totalorder %s2414_s9, %s2414_s9 }
 0xb74   :  { %v2010_v55 = vcombine.low %v2002_v54, %v2009_v22 }
 0xb76   :  { %v2012_v42 = vadd.f32 %v2522_v6, %v2010_v55  ;;  %v2547_v6 = vld [vmem:[%s4088_s10] ss:$0 sm:$0xff]  ;;  %s2831_s10 = scalar_lea.vmem %s2414_s9, 32 }
 0xb77   :  { %p2832_p8 = scmp.ne.s32.totalorder %s2414_s9, %s2831_s10  ;;  %p2837_p10 = scmp.lt.s32.totalorder %s2831_s10, %s2831_s10 }
 0xb78   :  { %v2524_v56 = vmul.f32 -1.442695, %v2012_v42 }
 0xb79   :  { %p2838_p11 = por %p2837_p10, %p2836_p9 }
 0xb7a   :  { %2743 = vpow2.f32 %v2524_v56 }
 0xb7b   :  { %p2839_p12 = pnand %p2838_p11, %p2832_p8 }
 0xb84   :  { %v2744_v44 = vpop.eup %2743 }
 0xb85   :  { %v2016_v57 = vadd.f32 1.0, %v2744_v44 }
 0xb87   :  { %2745 = vrcp.f32 %v2016_v57 }
 0xb91   :  { %v2746_v47 = vpop.eup %2745 }
 0xb92   :  { %2042 = vrot.lane.b32.xlu1 %v2746_v47, %s2862_s23 }
 0xb9e   :  { %v1983_v37 = vpop.f32.mrb[44].mxu1 }
 0xb9f   :  { %v2020_v10 = vadd.f32 %v1983_v37, %v3209_v40  ;;  %v1985_v34 = vpop.f32.mrb[45].mxu1 }
 0xba0   :  { %v1986_v43 = vpop.f32.mrb[46].mxu1 }
 0xba1   :  { %v2023_v39 = vcombine.low %v2019_v8, %v2020_v10  ;;  %v1987_v24 = vpop.f32.mrb[47].mxu1 }
 0xba3   :  { %v2030_v33 = vrot.slane %v2023_v39, %v3196_v36 }
 0xba5   :  { %v2032_v30 = vmul.f32 %v2746_v47, %v2030_v33 }
 0xba7   :  { %v2039_v14 = vadd.f32 %v2037_v46, %v2032_v30 }
 0xba9   :  { %2747 = vtanh.f32 %v2039_v14 }
 0xbb3   :  { %v2748_v38 = vpop.eup %2747 }
 0xc04   :  { %v2043_v60 = vpop.permute.xlu1 %2042 }
 0xc05   :  { %v2044_v62 = vrot.slane %v2043_v60, 2  ;;  %v2045_v40 = vrot.slane %v2043_v60, 4 }
 0xc07   :  { %v2046_v3 = vsel %vm456_vm1, %v2044_v62, %v2045_v40 }
 0xc08   :  { %v2048_v45 = vsub.f32 1.0, %v2046_v3  ;;  %v2050_v5 = vmul.f32 %v2046_v3, %v3913_v48  ;;  %v2695_v48 = vld [vmem:[%s4085_s7 + $0x10] sm:$0xff]  }
 0xc09   :  { %2569 = vmatpush3.bf16.msra.mxu1 %v2695_v48 }
 0xc0a   :  { %v2049_v49 = vmul.f32 %v2748_v38, %v2048_v45  ;;  %2570 = vmatprep.subr.bf16.mxu1 %v2863_v0 }
 0xc0c   :  { %v2051_v7 = vadd.f32 %v2050_v5, %v2049_v49 }
 0xc0e   :  { %v2059_v9 = vrot.slane %v2051_v7, %v3196_v36  ;;  %v2696_v36 = vld [vmem:[%s4085_s7 + $0x18] sm:$0xff]  }
 0xc0f   :  { %2571 = vmatpush3.bf16.msra.mxu1 %v2696_v36 }
 0xc10   :  { %v2060_v11 = vcombine.high %v2059_v9, %v2059_v9  ;;  %v2063_v2 = vpack.c.bf16 %v2059_v9, %v2059_v9  ;;  %2576 = vmatprep.subr.bf16.mxu1 %v2863_v0 }
 0xc12   :  { %v2064_v13 = vpack.c.bf16 %v2060_v11, %v2060_v11 }
 0xc14   :  { %2537 = vmatprep.mubr.msk.bf16.mxu0 %vm456_vm1, %v2064_v13 }
 0xc15   :  { %2198 = vmatmul.mubr.bf16.vlgmr.msra.gmra.mrb[48].mxu0 %v2063_v2 }
 0xce8   :  { %v2199_v51 = vpop.f32.mrb[48].mxu0 }
 0xce9   :  { %v2200_v35 = vadd.f32 %v2199_v51, %v2089_v28  ;;  %v2201_v21 = vpop.f32.mrb[49].mxu0 }
 0xcea   :  { %v2202_v17 = vpop.f32.mrb[50].mxu0 }
 0xceb   :  { %v2212_v19 = vmul.f32 %v2538_v12, %v2200_v35  ;;  %v2203_v41 = vpop.f32.mrb[51].mxu0 }
 0xced   :  { %v2220_v23 = vadd.f32 %v2539_v15, %v2212_v19 }
 0xcef   :  { %v2221_v18 = vmax.f32 %v2220_v23, 0.0 }
 0xcf1   :  { %v2222_v27 = vpack.c.bf16 %v2221_v18, %v2221_v18 }
 0xcf3   :  { %2573 = vmatmul.mubr.msk.bf16.vlgmr.msra.gmra.mrb[48].mxu1 %vm456_vm1, %v2222_v27 }
 0xcf4   :  { %2577 = vmatpush3.bf16.msra.mxu1 %v2697_v25  ;;  %2584 = vmatprep.mubr.msk.bf16.mxu1 %vm2864_vm2, %v2863_v0 }
 0xcf5   :  { %2578 = vmatprep.subr.bf16.mxu1 %v2863_v0 }
 0xcf8   :  { %2579 = vmatpush3.bf16.msra.mxu1 %v2698_v16 }
 0xcf9   :  { %2580 = vmatprep.subr.bf16.mxu1 %v2863_v0 }
 0xcfc   :  { %2581 = vmatpush3.bf16.msra.mxu1 %v2699_v61 }
 0xcfd   :  { %2582 = vmatprep.subr.bf16.mxu1 %v2863_v0 }
 0xd00   :  { %2583 = vmatpush3.bf16.msra.mxu1 %v2700_v26 }
 0xdc6   :  { %v2299_v4 = vpop.f32.mrb[48].mxu1 }
 0xdc7   :  { %v2300_v22 = vadd.f32 %v2540_v52, %v2299_v4  ;;  %v2574_v54 = vpop.f32.mrb[49].mxu1 }
 0xdc8   :  { %v2302_v55 = vpop.f32.mrb[50].mxu1 }
 0xdc9   :  { %v2312_v42 = vmul.f32 %v2546_v53, %v2300_v22  ;;  %v2575_v56 = vpop.f32.mrb[51].mxu1 }
 0xdcb   :  { %v2320_v44 = vadd.f32 %v2547_v6, %v2312_v42 }
 0xdcd   :  { %v2321_v57 = vmax.f32 %v2320_v44, 0.0 }
 0xdcf   :  { %v2322_v20 = vpack.c.bf16 %v2321_v57, %v2321_v57 }
 0xdd1   :  { %2585 = vmatmul.mubr.msk.bf16.vlgmr.msra.gmra.mrb[52].mxu1 %vm456_vm1, %v2322_v20 }
 0xea4   :  { %v2399_v29 = vpop.f32.mrb[52].mxu1 }
 0xea5   :  { %v2400_v63 = vadd.f32 %v2548_v58, %v2399_v29  ;;  %v2586_v47 = vpop.f32.mrb[53].mxu1 }
 0xea6   :  { %v2402_v32 = vpop.f32.mrb[54].mxu1 }
 0xea7   :  { %v2587_v0 = vpop.f32.mrb[55].mxu1  ;;  %2406 = vst.msk [vmem:[#allocation5] sm:$0x3] %vm2405_vm3, %v2400_v63 }
 0xea8   :  { %2842 = shalt.err (!%p2839_p12)
}
 0xea9   :  { %s2843_s12 = scalar_lea.hbm %s4091_s13, 32 }
 0xeaa   :  { %p2844_p13 = scmp.ne.s32.totalorder %s4091_s13, %s2843_s12  ;;  %p2847_p0 = scmp.lt.u32.totalorder %s2843_s12, %s4091_s13 }
 0xeac   :  { %p2849_p1 = pnand %p2847_p0, %p2844_p13 }
 0xeae   :  { %2852 = shalt.err (!%p2849_p1)
}
 0xeaf   :  { %2416 = dma.vmem_to_hbm [thread:$0]  %s2414_s9, 32, %s4091_s13, [#allocation4]  }
 0xeb0   :  { %2855 = dma.done.wait [#allocation4], 32  }
 0xeb1   :  { %2856 = vsyncadd [#allocation4], 4294967264 }
 0xeb2   :  { %2420 = vsyncpa [#allocation3], 1 }
 0xeb3   :  { %2421 = vsyncpa [#allocation4], 1 }

</bundles_post_ra>
